<compile_context>
chip_gen: v7x
topology: tpu7x:2x2x1
jax: 0.10.0
libtpu: 0.0.40
codegen_flags: <defaults>
</compile_context>

<pallas_src>
import math
import functools

import jax
import jax.numpy as jnp
from jax import lax
from jax.experimental import pallas as pl
from jax.experimental.pallas import tpu as pltpu

# ---- small, self-consistent config ------------------------------------------------
PAD_ID, CLS_ID, SEP_ID = 1, 2, 3      # KoBERT tokenizer conventions
B, S, H = 2, 8, 32                    # batch, seq len, hidden size
FFN = 4 * H
VOCAB = 64
N_LAYERS = 2
LN_EPS = 1e-12                        # config.layernorm_eps
R = 2 * B * S                         # flattened (src+trg) row count = 32


def _layer_norm(x, g, b, eps):
    mu = jnp.mean(x, axis=-1, keepdims=True)
    var = jnp.mean((x - mu) ** 2, axis=-1, keepdims=True)
    return (x - mu) * lax.rsqrt(var + eps) * g + b


# ===================================================================================
# Fused Pallas kernel: embedding-LN -> N encoder layers -> CLIP head, one program.
#   x_ref      : (R, H)   src+trg embeddings (word + pos), pre-LN, flattened rows
#   mask_ref   : (R, R)   additive attention mask (0 allowed / -1e9 otherwise);
#                         block-diagonal across batches + key-padding mask
#   gth_ref    : (2B, R)  one-hot EOS-row gather matrix
#   per-layer weights are stacked on a leading N_LAYERS axis
# ===================================================================================
def fused_kernel(x_ref, mask_ref, gth_ref,
                 embg_ref, embb_ref,
                 wqkv_ref, bqkv_ref, wo_ref, bo_ref, ln1g_ref, ln1b_ref,
                 w1_ref, b1_ref, w2_ref, b2_ref, ln2g_ref, ln2b_ref,
                 lng_ref, lnb_ref, ws_ref, bs_ref, wt_ref, bt_ref, temp_ref,
                 sim_ref, srcf_ref, trgf_ref):
    # embedding LayerNorm (row-wise, batch structure irrelevant)
    x = _layer_norm(x_ref[...], embg_ref[...], embb_ref[...], LN_EPS)        # (R, H)
    mask = mask_ref[...]                                                     # (R, R)
    inv_sqrt_h = 1.0 / math.sqrt(H)

    # ---- encoder layers (static unroll, weights stay VMEM-resident) ----
    for l in range(N_LAYERS):
        qkv = jnp.dot(x, wqkv_ref[l], preferred_element_type=jnp.float32) + bqkv_ref[l]
        q = qkv[:, 0:H]
        k = qkv[:, H:2 * H]
        v = qkv[:, 2 * H:3 * H]

        scores = lax.dot_general(q, k, (((1,), (1,)), ((), ())),
                                 preferred_element_type=jnp.float32)         # (R, R)
        scores = scores * inv_sqrt_h + mask
        scores = scores - jnp.max(scores, axis=-1, keepdims=True)
        p = jnp.exp(scores)
        p = p * pl.reciprocal(jnp.sum(p, axis=-1, keepdims=True), approx=True)

        ctx = jnp.dot(p, v, preferred_element_type=jnp.float32)              # (R, H)
        attn = jnp.dot(ctx, wo_ref[l], preferred_element_type=jnp.float32) + bo_ref[l]
        h1 = _layer_norm(x + attn, ln1g_ref[l], ln1b_ref[l], LN_EPS)

        f = jnp.dot(h1, w1_ref[l], preferred_element_type=jnp.float32) + b1_ref[l]
        f = jax.nn.gelu(f, approximate=True)
        f = jnp.dot(f, w2_ref[l], preferred_element_type=jnp.float32) + b2_ref[l]
        x = _layer_norm(h1 + f, ln2g_ref[l], ln2b_ref[l], LN_EPS)

    # ---- CLIP head ----
    # gather EOS rows with a single MXU matmul (LN commutes with the row gather)
    eos_h = jnp.dot(gth_ref[...], x, preferred_element_type=jnp.float32)     # (2B, H)
    eos_h = _layer_norm(eos_h, lng_ref[...], lnb_ref[...], LN_EPS)
    src_e = eos_h[0:B]
    trg_e = eos_h[B:2 * B]

    src_p = jnp.dot(src_e, ws_ref[...], preferred_element_type=jnp.float32) + bs_ref[...]
    trg_p = jnp.dot(trg_e, wt_ref[...], preferred_element_type=jnp.float32) + bt_ref[...]

    # F.normalize(x): x / max(||x||_2, 1e-12)  (divide -> EUP reciprocal)
    src_n = src_p * pl.reciprocal(
        jnp.maximum(jnp.sqrt(jnp.sum(src_p * src_p, axis=-1, keepdims=True)), 1e-12),
        approx=True)
    trg_n = trg_p * pl.reciprocal(
        jnp.maximum(jnp.sqrt(jnp.sum(trg_p * trg_p, axis=-1, keepdims=True)), 1e-12),
        approx=True)

    scale = jnp.exp(temp_ref[0, 0])
    sim_ref[...] = lax.dot_general(src_n, trg_n, (((1,), (1,)), ((), ())),
                                   preferred_element_type=jnp.float32) * scale
    srcf_ref[...] = src_n
    trgf_ref[...] = trg_n


def fused_forward_call(x_flat, mask_big, gather_mat, params):
    plist = [params["emb_ln_g"], params["emb_ln_b"],
             params["wqkv"], params["bqkv"], params["wo"], params["bo"],
             params["ln1_g"], params["ln1_b"],
             params["w1"], params["b1"], params["w2"], params["b2"],
             params["ln2_g"], params["ln2_b"],
             params["ln_g"], params["ln_b"],
             params["w_src"], params["b_src"], params["w_trg"], params["b_trg"],
             params["temperature"]]

    def full(a):
        nd = a.ndim
        return pl.BlockSpec(a.shape, lambda i, nd=nd: (0,) * nd)

    in_specs = [full(x_flat), full(mask_big), full(gather_mat)] + [full(p) for p in plist]
    out_shapes = (jax.ShapeDtypeStruct((B, B), jnp.float32),
                  jax.ShapeDtypeStruct((B, H), jnp.float32),
                  jax.ShapeDtypeStruct((B, H), jnp.float32))
    out_specs = (pl.BlockSpec((B, B), lambda i: (0, 0)),
                 pl.BlockSpec((B, H), lambda i: (0, 0)),
                 pl.BlockSpec((B, H), lambda i: (0, 0)))

    return pl.pallas_call(
        fused_kernel,
        out_shape=out_shapes,
        grid=(1,),
        in_specs=in_specs,
        out_specs=out_specs,
        compiler_params=pltpu.CompilerParams(dimension_semantics=("arbitrary",)),
    )(x_flat, mask_big, gather_mat, *plist)


# ===================================================================================
# Glue: parameter init, embedding lookup, mask / eos gather construction
# ===================================================================================
def init_params(key):
    keys = iter(jax.random.split(key, 16))

    def nrm(shape):
        return (0.02 * jax.random.normal(next(keys), shape)).astype(jnp.float32)

    def ones(shape):
        return jnp.ones(shape, jnp.float32)

    def zeros(shape):
        return jnp.zeros(shape, jnp.float32)

    # linear weights stored as (in, out), i.e. already transposed vs torch's (out, in)
    return dict(
        word_emb=nrm((VOCAB, H)),
        pos_emb=nrm((S, H)),
        emb_ln_g=ones((1, H)), emb_ln_b=zeros((1, H)),
        # layer-stacked encoder weights (leading axis = layer)
        wqkv=nrm((N_LAYERS, H, 3 * H)), bqkv=zeros((N_LAYERS, 1, 3 * H)),
        wo=nrm((N_LAYERS, H, H)), bo=zeros((N_LAYERS, 1, H)),
        ln1_g=ones((N_LAYERS, 1, H)), ln1_b=zeros((N_LAYERS, 1, H)),
        w1=nrm((N_LAYERS, H, FFN)), b1=zeros((N_LAYERS, 1, FFN)),
        w2=nrm((N_LAYERS, FFN, H)), b2=zeros((N_LAYERS, 1, H)),
        ln2_g=ones((N_LAYERS, 1, H)), ln2_b=zeros((N_LAYERS, 1, H)),
        # CLIP head
        ln_g=ones((1, H)), ln_b=zeros((1, H)),            # self.layer_norm
        w_src=nrm((H, H)), b_src=zeros((1, H)),           # self.src_wts
        w_trg=nrm((H, H)), b_trg=zeros((1, H)),           # self.trg_wts
        temperature=jnp.full((1, 1), math.log(1.0 / 0.07), jnp.float32),
    )


def kobert_clip_forward(src_ids, trg_ids, params):
    ids = jnp.concatenate([src_ids, trg_ids], axis=0)                 # (2B, S)

    # embedding gather + positional embedding (vocab gather stays in JAX glue)
    x = params["word_emb"][ids] + params["pos_emb"][None, :, :]       # (2B, S, H)
    x_flat = x.reshape(R, H)                                          # fold batch->sublane

    # make_mask -> additive block-diagonal attention mask over the flattened rows:
    # row i may attend to key j iff same batch AND key j is not padding.
    key_ok = (ids != PAD_ID).astype(jnp.float32).reshape(R)           # (R,)
    row_batch = jnp.repeat(jnp.arange(2 * B, dtype=jnp.int32), S)     # batch id per row
    same_batch = (row_batch[:, None] == row_batch[None, :]).astype(jnp.float32)
    mask_big = (same_batch * key_ok[None, :] - 1.0) * 1e9             # (R, R) 0 / -1e9

    # find_eos: first [SEP] position per sequence -> one-hot gather matrix over flat rows
    # (argmax returns 0 when no [SEP] is present, matching the torch reference)
    eos = jnp.argmax((ids == SEP_ID).astype(jnp.int32), axis=1)       # (2B,)
    flat_eos = jnp.arange(2 * B, dtype=jnp.int32) * S + eos
    gather_mat = jax.nn.one_hot(flat_eos, R, dtype=jnp.float32)       # (2B, R)

    sim, src_f, trg_f = fused_forward_call(x_flat, mask_big, gather_mat, params)
    return sim, src_f, trg_f


if __name__ == "__main__":
    params = init_params(jax.random.PRNGKey(0))

    # deterministic toy token-id inputs (pad=1, cls=2, sep=3)
    src_ids = jnp.array([[CLS_ID, 10, 11, 12, SEP_ID, PAD_ID, PAD_ID, PAD_ID],
                         [CLS_ID, 20, 21, 22, 23, 24, SEP_ID, PAD_ID]], jnp.int32)
    trg_ids = jnp.array([[CLS_ID, 30, 31, SEP_ID, PAD_ID, PAD_ID, PAD_ID, PAD_ID],
                         [CLS_ID, 40, 41, 42, 43, SEP_ID, PAD_ID, PAD_ID]], jnp.int32)

    fwd = jax.jit(functools.partial(kobert_clip_forward, params=params))
    sim, src_f, trg_f = fwd(src_ids, trg_ids)
    jax.block_until_ready((sim, src_f, trg_f))

    assert sim.shape == (B, B)
    assert src_f.shape == (B, H) and trg_f.shape == (B, H)
    assert bool(jnp.all(jnp.isfinite(sim)))
    assert bool(jnp.all(jnp.isfinite(src_f))) and bool(jnp.all(jnp.isfinite(trg_f)))
    print("KERNEL_OK")
</pallas_src>

<mosaic_0001>
module attributes {stable_mosaic.version = 11 : i64} {
  func.func @fused_kernel(%arg0: i32, %arg1: memref<32x32xf32, #tpu.memory_space<vmem>>, %arg2: memref<32x32xf32, #tpu.memory_space<vmem>>, %arg3: memref<4x32xf32, #tpu.memory_space<vmem>>, %arg4: memref<1x32xf32, #tpu.memory_space<vmem>>, %arg5: memref<1x32xf32, #tpu.memory_space<vmem>>, %arg6: memref<2x32x96xf32, #tpu.memory_space<vmem>>, %arg7: memref<2x1x96xf32, #tpu.memory_space<vmem>>, %arg8: memref<2x32x32xf32, #tpu.memory_space<vmem>>, %arg9: memref<2x1x32xf32, #tpu.memory_space<vmem>>, %arg10: memref<2x1x32xf32, #tpu.memory_space<vmem>>, %arg11: memref<2x1x32xf32, #tpu.memory_space<vmem>>, %arg12: memref<2x32x128xf32, #tpu.memory_space<vmem>>, %arg13: memref<2x1x128xf32, #tpu.memory_space<vmem>>, %arg14: memref<2x128x32xf32, #tpu.memory_space<vmem>>, %arg15: memref<2x1x32xf32, #tpu.memory_space<vmem>>, %arg16: memref<2x1x32xf32, #tpu.memory_space<vmem>>, %arg17: memref<2x1x32xf32, #tpu.memory_space<vmem>>, %arg18: memref<1x32xf32, #tpu.memory_space<vmem>>, %arg19: memref<1x32xf32, #tpu.memory_space<vmem>>, %arg20: memref<32x32xf32, #tpu.memory_space<vmem>>, %arg21: memref<1x32xf32, #tpu.memory_space<vmem>>, %arg22: memref<32x32xf32, #tpu.memory_space<vmem>>, %arg23: memref<1x32xf32, #tpu.memory_space<vmem>>, %arg24: memref<1x1xf32, #tpu.memory_space<vmem>>, %arg25: memref<2x2xf32, #tpu.memory_space<vmem>>, %arg26: memref<2x32xf32, #tpu.memory_space<vmem>>, %arg27: memref<2x32xf32, #tpu.memory_space<vmem>>) attributes {dimension_semantics = [#tpu.dimension_semantics<arbitrary>], iteration_bounds = array<i64: 1>, scalar_prefetch = 0 : i64, scratch_operands = 0 : i64, tpu.core_type = #tpu.core_type<tc>, window_params = [{pipeline_mode = #tpu.pipeline_mode<synchronous>, transform_indices = @transform_0, window_bounds = array<i64: 32, 32>}, {pipeline_mode = #tpu.pipeline_mode<synchronous>, transform_indices = @transform_1, window_bounds = array<i64: 32, 32>}, {pipeline_mode = #tpu.pipeline_mode<synchronous>, transform_indices = @transform_2, window_bounds = array<i64: 4, 32>}, {pipeline_mode = #tpu.pipeline_mode<synchronous>, transform_indices = @transform_3, window_bounds = array<i64: 1, 32>}, {pipeline_mode = #tpu.pipeline_mode<synchronous>, transform_indices = @transform_4, window_bounds = array<i64: 1, 32>}, {pipeline_mode = #tpu.pipeline_mode<synchronous>, transform_indices = @transform_5, window_bounds = array<i64: 2, 32, 96>}, {pipeline_mode = #tpu.pipeline_mode<synchronous>, transform_indices = @transform_6, window_bounds = array<i64: 2, 1, 96>}, {pipeline_mode = #tpu.pipeline_mode<synchronous>, transform_indices = @transform_7, window_bounds = array<i64: 2, 32, 32>}, {pipeline_mode = #tpu.pipeline_mode<synchronous>, transform_indices = @transform_8, window_bounds = array<i64: 2, 1, 32>}, {pipeline_mode = #tpu.pipeline_mode<synchronous>, transform_indices = @transform_9, window_bounds = array<i64: 2, 1, 32>}, {pipeline_mode = #tpu.pipeline_mode<synchronous>, transform_indices = @transform_10, window_bounds = array<i64: 2, 1, 32>}, {pipeline_mode = #tpu.pipeline_mode<synchronous>, transform_indices = @transform_11, window_bounds = array<i64: 2, 32, 128>}, {pipeline_mode = #tpu.pipeline_mode<synchronous>, transform_indices = @transform_12, window_bounds = array<i64: 2, 1, 128>}, {pipeline_mode = #tpu.pipeline_mode<synchronous>, transform_indices = @transform_13, window_bounds = array<i64: 2, 128, 32>}, {pipeline_mode = #tpu.pipeline_mode<synchronous>, transform_indices = @transform_14, window_bounds = array<i64: 2, 1, 32>}, {pipeline_mode = #tpu.pipeline_mode<synchronous>, transform_indices = @transform_15, window_bounds = array<i64: 2, 1, 32>}, {pipeline_mode = #tpu.pipeline_mode<synchronous>, transform_indices = @transform_16, window_bounds = array<i64: 2, 1, 32>}, {pipeline_mode = #tpu.pipeline_mode<synchronous>, transform_indices = @transform_17, window_bounds = array<i64: 1, 32>}, {pipeline_mode = #tpu.pipeline_mode<synchronous>, transform_indices = @transform_18, window_bounds = array<i64: 1, 32>}, {pipeline_mode = #tpu.pipeline_mode<synchronous>, transform_indices = @transform_19, window_bounds = array<i64: 32, 32>}, {pipeline_mode = #tpu.pipeline_mode<synchronous>, transform_indices = @transform_20, window_bounds = array<i64: 1, 32>}, {pipeline_mode = #tpu.pipeline_mode<synchronous>, transform_indices = @transform_21, window_bounds = array<i64: 32, 32>}, {pipeline_mode = #tpu.pipeline_mode<synchronous>, transform_indices = @transform_22, window_bounds = array<i64: 1, 32>}, {pipeline_mode = #tpu.pipeline_mode<synchronous>, transform_indices = @transform_23, window_bounds = array<i64: 1, 1>}, {pipeline_mode = #tpu.pipeline_mode<synchronous>, transform_indices = @transform_24, window_bounds = array<i64: 2, 2>}, {pipeline_mode = #tpu.pipeline_mode<synchronous>, transform_indices = @transform_25, window_bounds = array<i64: 2, 32>}, {pipeline_mode = #tpu.pipeline_mode<synchronous>, transform_indices = @transform_26, window_bounds = array<i64: 2, 32>}]} {
    %c0 = arith.constant 0 : index
    %c0_0 = arith.constant 0 : index
    %0 = vector.load %arg1[%c0, %c0_0] : memref<32x32xf32, #tpu.memory_space<vmem>>, vector<32x32xf32>
    %c0_1 = arith.constant 0 : index
    %c0_2 = arith.constant 0 : index
    %1 = vector.load %arg4[%c0_1, %c0_2] : memref<1x32xf32, #tpu.memory_space<vmem>>, vector<1x32xf32>
    %c0_3 = arith.constant 0 : index
    %c0_4 = arith.constant 0 : index
    %2 = vector.load %arg5[%c0_3, %c0_4] : memref<1x32xf32, #tpu.memory_space<vmem>>, vector<1x32xf32>
    %cst = arith.constant dense<0.000000e+00> : vector<32xf32>
    %3 = vector.multi_reduction <add>, %0, %cst [1] : vector<32x32xf32> to vector<32xf32>
    %4 = vector.shape_cast %3 : vector<32xf32> to vector<32x1xf32>
    %cst_5 = arith.constant 3.200000e+01 : f32
    %5 = vector.broadcast %cst_5 : f32 to vector<32x1xf32>
    %6 = arith.divf %4, %5 : vector<32x1xf32>
    %7 = vector.broadcast %6 : vector<32x1xf32> to vector<32x32xf32>
    %8 = arith.subf %0, %7 : vector<32x32xf32>
    %9 = arith.mulf %8, %8 : vector<32x32xf32>
    %cst_6 = arith.constant dense<0.000000e+00> : vector<32xf32>
    %10 = vector.multi_reduction <add>, %9, %cst_6 [1] : vector<32x32xf32> to vector<32xf32>
    %11 = vector.shape_cast %10 : vector<32xf32> to vector<32x1xf32>
    %cst_7 = arith.constant 3.200000e+01 : f32
    %12 = vector.broadcast %cst_7 : f32 to vector<32x1xf32>
    %13 = arith.divf %11, %12 : vector<32x1xf32>
    %14 = vector.broadcast %6 : vector<32x1xf32> to vector<32x32xf32>
    %15 = arith.subf %0, %14 : vector<32x32xf32>
    %cst_8 = arith.constant 9.99999996E-13 : f32
    %16 = vector.broadcast %cst_8 : f32 to vector<32x1xf32>
    %17 = arith.addf %13, %16 : vector<32x1xf32>
    %18 = math.rsqrt %17 : vector<32x1xf32>
    %19 = vector.broadcast %18 : vector<32x1xf32> to vector<32x32xf32>
    %20 = arith.mulf %15, %19 : vector<32x32xf32>
    %21 = vector.broadcast %1 : vector<1x32xf32> to vector<32x32xf32>
    %22 = arith.mulf %20, %21 : vector<32x32xf32>
    %23 = vector.broadcast %2 : vector<1x32xf32> to vector<32x32xf32>
    %24 = arith.addf %22, %23 : vector<32x32xf32>
    %c0_9 = arith.constant 0 : index
    %c0_10 = arith.constant 0 : index
    %25 = vector.load %arg2[%c0_9, %c0_10] : memref<32x32xf32, #tpu.memory_space<vmem>>, vector<32x32xf32>
    %c0_11 = arith.constant 0 : index
    %c0_12 = arith.constant 0 : index
    %c0_13 = arith.constant 0 : index
    %26 = vector.load %arg6[%c0_11, %c0_12, %c0_13] : memref<2x32x96xf32, #tpu.memory_space<vmem>>, vector<1x32x96xf32>
    %27 = vector.shape_cast %26 : vector<1x32x96xf32> to vector<32x96xf32>
    %cst_14 = arith.constant dense<0.000000e+00> : vector<32x96xf32>
    %28 = tpu.matmul %24, %27, %cst_14 {dimension_numbers = #tpu.dot_dimension_numbers<[1], [0], [0], [1], [0, 0, 1, 1], [], []>} : vector<32x32xf32>, vector<32x96xf32>, vector<32x96xf32> -> vector<32x96xf32>
    %c0_15 = arith.constant 0 : index
    %c0_16 = arith.constant 0 : index
    %c0_17 = arith.constant 0 : index
    %29 = vector.load %arg7[%c0_15, %c0_16, %c0_17] : memref<2x1x96xf32, #tpu.memory_space<vmem>>, vector<1x1x96xf32>
    %30 = vector.shape_cast %29 : vector<1x1x96xf32> to vector<1x96xf32>
    %31 = vector.broadcast %30 : vector<1x96xf32> to vector<32x96xf32>
    %32 = arith.addf %28, %31 : vector<32x96xf32>
    %33 = vector.extract_strided_slice %32 {offsets = [0, 0], sizes = [32, 32], strides = [1, 1]} : vector<32x96xf32> to vector<32x32xf32>
    %34 = vector.extract_strided_slice %32 {offsets = [0, 32], sizes = [32, 32], strides = [1, 1]} : vector<32x96xf32> to vector<32x32xf32>
    %35 = vector.extract_strided_slice %32 {offsets = [0, 64], sizes = [32, 32], strides = [1, 1]} : vector<32x96xf32> to vector<32x32xf32>
    %cst_18 = arith.constant dense<0.000000e+00> : vector<32x32xf32>
    %36 = tpu.matmul %33, %34, %cst_18 {dimension_numbers = #tpu.dot_dimension_numbers<[1], [1], [0], [0], [0, 0, 1, 0], [], []>} : vector<32x32xf32>, vector<32x32xf32>, vector<32x32xf32> -> vector<32x32xf32>
    %cst_19 = arith.constant 0.176776692 : f32
    %37 = vector.broadcast %cst_19 : f32 to vector<32x32xf32>
    %38 = arith.mulf %36, %37 : vector<32x32xf32>
    %39 = arith.addf %38, %25 : vector<32x32xf32>
    %cst_20 = arith.constant dense<0xFF800000> : vector<32xf32>
    %40 = vector.multi_reduction <maximumf>, %39, %cst_20 [1] : vector<32x32xf32> to vector<32xf32>
    %41 = vector.shape_cast %40 : vector<32xf32> to vector<32x1xf32>
    %42 = vector.broadcast %41 : vector<32x1xf32> to vector<32x32xf32>
    %43 = arith.subf %39, %42 : vector<32x32xf32>
    %44 = math.exp %43 : vector<32x32xf32>
    %cst_21 = arith.constant dense<0.000000e+00> : vector<32xf32>
    %45 = vector.multi_reduction <add>, %44, %cst_21 [1] : vector<32x32xf32> to vector<32xf32>
    %46 = vector.shape_cast %45 : vector<32xf32> to vector<32x1xf32>
    %47 = tpu.reciprocal %46 {approx = true} : vector<32x1xf32> -> vector<32x1xf32>
    %48 = vector.broadcast %47 : vector<32x1xf32> to vector<32x32xf32>
    %49 = arith.mulf %44, %48 : vector<32x32xf32>
    %cst_22 = arith.constant dense<0.000000e+00> : vector<32x32xf32>
    %50 = tpu.matmul %49, %35, %cst_22 {dimension_numbers = #tpu.dot_dimension_numbers<[1], [0], [0], [1], [0, 0, 1, 1], [], []>} : vector<32x32xf32>, vector<32x32xf32>, vector<32x32xf32> -> vector<32x32xf32>
    %c0_23 = arith.constant 0 : index
    %c0_24 = arith.constant 0 : index
    %c0_25 = arith.constant 0 : index
    %51 = vector.load %arg8[%c0_23, %c0_24, %c0_25] : memref<2x32x32xf32, #tpu.memory_space<vmem>>, vector<1x32x32xf32>
    %52 = vector.shape_cast %51 : vector<1x32x32xf32> to vector<32x32xf32>
    %cst_26 = arith.constant dense<0.000000e+00> : vector<32x32xf32>
    %53 = tpu.matmul %50, %52, %cst_26 {dimension_numbers = #tpu.dot_dimension_numbers<[1], [0], [0], [1], [0, 0, 1, 1], [], []>} : vector<32x32xf32>, vector<32x32xf32>, vector<32x32xf32> -> vector<32x32xf32>
    %c0_27 = arith.constant 0 : index
    %c0_28 = arith.constant 0 : index
    %c0_29 = arith.constant 0 : index
    %54 = vector.load %arg9[%c0_27, %c0_28, %c0_29] : memref<2x1x32xf32, #tpu.memory_space<vmem>>, vector<1x1x32xf32>
    %55 = vector.shape_cast %54 : vector<1x1x32xf32> to vector<1x32xf32>
    %56 = vector.broadcast %55 : vector<1x32xf32> to vector<32x32xf32>
    %57 = arith.addf %53, %56 : vector<32x32xf32>
    %58 = arith.addf %24, %57 : vector<32x32xf32>
    %c0_30 = arith.constant 0 : index
    %c0_31 = arith.constant 0 : index
    %c0_32 = arith.constant 0 : index
    %59 = vector.load %arg10[%c0_30, %c0_31, %c0_32] : memref<2x1x32xf32, #tpu.memory_space<vmem>>, vector<1x1x32xf32>
    %60 = vector.shape_cast %59 : vector<1x1x32xf32> to vector<1x32xf32>
    %c0_33 = arith.constant 0 : index
    %c0_34 = arith.constant 0 : index
    %c0_35 = arith.constant 0 : index
    %61 = vector.load %arg11[%c0_33, %c0_34, %c0_35] : memref<2x1x32xf32, #tpu.memory_space<vmem>>, vector<1x1x32xf32>
    %62 = vector.shape_cast %61 : vector<1x1x32xf32> to vector<1x32xf32>
    %cst_36 = arith.constant dense<0.000000e+00> : vector<32xf32>
    %63 = vector.multi_reduction <add>, %58, %cst_36 [1] : vector<32x32xf32> to vector<32xf32>
    %64 = vector.shape_cast %63 : vector<32xf32> to vector<32x1xf32>
    %cst_37 = arith.constant 3.200000e+01 : f32
    %65 = vector.broadcast %cst_37 : f32 to vector<32x1xf32>
    %66 = arith.divf %64, %65 : vector<32x1xf32>
    %67 = vector.broadcast %66 : vector<32x1xf32> to vector<32x32xf32>
    %68 = arith.subf %58, %67 : vector<32x32xf32>
    %69 = arith.mulf %68, %68 : vector<32x32xf32>
    %cst_38 = arith.constant dense<0.000000e+00> : vector<32xf32>
    %70 = vector.multi_reduction <add>, %69, %cst_38 [1] : vector<32x32xf32> to vector<32xf32>
    %71 = vector.shape_cast %70 : vector<32xf32> to vector<32x1xf32>
    %cst_39 = arith.constant 3.200000e+01 : f32
    %72 = vector.broadcast %cst_39 : f32 to vector<32x1xf32>
    %73 = arith.divf %71, %72 : vector<32x1xf32>
    %74 = vector.broadcast %66 : vector<32x1xf32> to vector<32x32xf32>
    %75 = arith.subf %58, %74 : vector<32x32xf32>
    %cst_40 = arith.constant 9.99999996E-13 : f32
    %76 = vector.broadcast %cst_40 : f32 to vector<32x1xf32>
    %77 = arith.addf %73, %76 : vector<32x1xf32>
    %78 = math.rsqrt %77 : vector<32x1xf32>
    %79 = vector.broadcast %78 : vector<32x1xf32> to vector<32x32xf32>
    %80 = arith.mulf %75, %79 : vector<32x32xf32>
    %81 = vector.broadcast %60 : vector<1x32xf32> to vector<32x32xf32>
    %82 = arith.mulf %80, %81 : vector<32x32xf32>
    %83 = vector.broadcast %62 : vector<1x32xf32> to vector<32x32xf32>
    %84 = arith.addf %82, %83 : vector<32x32xf32>
    %c0_41 = arith.constant 0 : index
    %c0_42 = arith.constant 0 : index
    %c0_43 = arith.constant 0 : index
    %85 = vector.load %arg12[%c0_41, %c0_42, %c0_43] : memref<2x32x128xf32, #tpu.memory_space<vmem>>, vector<1x32x128xf32>
    %86 = vector.shape_cast %85 : vector<1x32x128xf32> to vector<32x128xf32>
    %cst_44 = arith.constant dense<0.000000e+00> : vector<32x128xf32>
    %87 = tpu.matmul %84, %86, %cst_44 {dimension_numbers = #tpu.dot_dimension_numbers<[1], [0], [0], [1], [0, 0, 1, 1], [], []>} : vector<32x32xf32>, vector<32x128xf32>, vector<32x128xf32> -> vector<32x128xf32>
    %c0_45 = arith.constant 0 : index
    %c0_46 = arith.constant 0 : index
    %c0_47 = arith.constant 0 : index
    %88 = vector.load %arg13[%c0_45, %c0_46, %c0_47] : memref<2x1x128xf32, #tpu.memory_space<vmem>>, vector<1x1x128xf32>
    %89 = vector.shape_cast %88 : vector<1x1x128xf32> to vector<1x128xf32>
    %90 = vector.broadcast %89 : vector<1x128xf32> to vector<32x128xf32>
    %91 = arith.addf %87, %90 : vector<32x128xf32>
    %92 = arith.mulf %91, %91 : vector<32x128xf32>
    %93 = arith.mulf %91, %92 : vector<32x128xf32>
    %cst_48 = arith.constant 4.471500e-02 : f32
    %94 = vector.broadcast %cst_48 : f32 to vector<32x128xf32>
    %95 = arith.mulf %94, %93 : vector<32x128xf32>
    %96 = arith.addf %91, %95 : vector<32x128xf32>
    %cst_49 = arith.constant 0.797884583 : f32
    %97 = vector.broadcast %cst_49 : f32 to vector<32x128xf32>
    %98 = arith.mulf %97, %96 : vector<32x128xf32>
    %99 = math.tanh %98 : vector<32x128xf32>
    %cst_50 = arith.constant 1.000000e+00 : f32
    %100 = vector.broadcast %cst_50 : f32 to vector<32x128xf32>
    %101 = arith.addf %100, %99 : vector<32x128xf32>
    %cst_51 = arith.constant 5.000000e-01 : f32
    %102 = vector.broadcast %cst_51 : f32 to vector<32x128xf32>
    %103 = arith.mulf %102, %101 : vector<32x128xf32>
    %104 = arith.mulf %91, %103 : vector<32x128xf32>
    %c0_52 = arith.constant 0 : index
    %c0_53 = arith.constant 0 : index
    %c0_54 = arith.constant 0 : index
    %105 = vector.load %arg14[%c0_52, %c0_53, %c0_54] : memref<2x128x32xf32, #tpu.memory_space<vmem>>, vector<1x128x32xf32>
    %106 = vector.shape_cast %105 : vector<1x128x32xf32> to vector<128x32xf32>
    %cst_55 = arith.constant dense<0.000000e+00> : vector<32x32xf32>
    %107 = tpu.matmul %104, %106, %cst_55 {dimension_numbers = #tpu.dot_dimension_numbers<[1], [0], [0], [1], [0, 0, 1, 1], [], []>} : vector<32x128xf32>, vector<128x32xf32>, vector<32x32xf32> -> vector<32x32xf32>
    %c0_56 = arith.constant 0 : index
    %c0_57 = arith.constant 0 : index
    %c0_58 = arith.constant 0 : index
    %108 = vector.load %arg15[%c0_56, %c0_57, %c0_58] : memref<2x1x32xf32, #tpu.memory_space<vmem>>, vector<1x1x32xf32>
    %109 = vector.shape_cast %108 : vector<1x1x32xf32> to vector<1x32xf32>
    %110 = vector.broadcast %109 : vector<1x32xf32> to vector<32x32xf32>
    %111 = arith.addf %107, %110 : vector<32x32xf32>
    %112 = arith.addf %84, %111 : vector<32x32xf32>
    %c0_59 = arith.constant 0 : index
    %c0_60 = arith.constant 0 : index
    %c0_61 = arith.constant 0 : index
    %113 = vector.load %arg16[%c0_59, %c0_60, %c0_61] : memref<2x1x32xf32, #tpu.memory_space<vmem>>, vector<1x1x32xf32>
    %114 = vector.shape_cast %113 : vector<1x1x32xf32> to vector<1x32xf32>
    %c0_62 = arith.constant 0 : index
    %c0_63 = arith.constant 0 : index
    %c0_64 = arith.constant 0 : index
    %115 = vector.load %arg17[%c0_62, %c0_63, %c0_64] : memref<2x1x32xf32, #tpu.memory_space<vmem>>, vector<1x1x32xf32>
    %116 = vector.shape_cast %115 : vector<1x1x32xf32> to vector<1x32xf32>
    %cst_65 = arith.constant dense<0.000000e+00> : vector<32xf32>
    %117 = vector.multi_reduction <add>, %112, %cst_65 [1] : vector<32x32xf32> to vector<32xf32>
    %118 = vector.shape_cast %117 : vector<32xf32> to vector<32x1xf32>
    %cst_66 = arith.constant 3.200000e+01 : f32
    %119 = vector.broadcast %cst_66 : f32 to vector<32x1xf32>
    %120 = arith.divf %118, %119 : vector<32x1xf32>
    %121 = vector.broadcast %120 : vector<32x1xf32> to vector<32x32xf32>
    %122 = arith.subf %112, %121 : vector<32x32xf32>
    %123 = arith.mulf %122, %122 : vector<32x32xf32>
    %cst_67 = arith.constant dense<0.000000e+00> : vector<32xf32>
    %124 = vector.multi_reduction <add>, %123, %cst_67 [1] : vector<32x32xf32> to vector<32xf32>
    %125 = vector.shape_cast %124 : vector<32xf32> to vector<32x1xf32>
    %cst_68 = arith.constant 3.200000e+01 : f32
    %126 = vector.broadcast %cst_68 : f32 to vector<32x1xf32>
    %127 = arith.divf %125, %126 : vector<32x1xf32>
    %128 = vector.broadcast %120 : vector<32x1xf32> to vector<32x32xf32>
    %129 = arith.subf %112, %128 : vector<32x32xf32>
    %cst_69 = arith.constant 9.99999996E-13 : f32
    %130 = vector.broadcast %cst_69 : f32 to vector<32x1xf32>
    %131 = arith.addf %127, %130 : vector<32x1xf32>
    %132 = math.rsqrt %131 : vector<32x1xf32>
    %133 = vector.broadcast %132 : vector<32x1xf32> to vector<32x32xf32>
    %134 = arith.mulf %129, %133 : vector<32x32xf32>
    %135 = vector.broadcast %114 : vector<1x32xf32> to vector<32x32xf32>
    %136 = arith.mulf %134, %135 : vector<32x32xf32>
    %137 = vector.broadcast %116 : vector<1x32xf32> to vector<32x32xf32>
    %138 = arith.addf %136, %137 : vector<32x32xf32>
    %c1 = arith.constant 1 : index
    %c0_70 = arith.constant 0 : index
    %c0_71 = arith.constant 0 : index
    %139 = vector.load %arg6[%c1, %c0_70, %c0_71] : memref<2x32x96xf32, #tpu.memory_space<vmem>>, vector<1x32x96xf32>
    %140 = vector.shape_cast %139 : vector<1x32x96xf32> to vector<32x96xf32>
    %cst_72 = arith.constant dense<0.000000e+00> : vector<32x96xf32>
    %141 = tpu.matmul %138, %140, %cst_72 {dimension_numbers = #tpu.dot_dimension_numbers<[1], [0], [0], [1], [0, 0, 1, 1], [], []>} : vector<32x32xf32>, vector<32x96xf32>, vector<32x96xf32> -> vector<32x96xf32>
    %c1_73 = arith.constant 1 : index
    %c0_74 = arith.constant 0 : index
    %c0_75 = arith.constant 0 : index
    %142 = vector.load %arg7[%c1_73, %c0_74, %c0_75] : memref<2x1x96xf32, #tpu.memory_space<vmem>>, vector<1x1x96xf32>
    %143 = vector.shape_cast %142 : vector<1x1x96xf32> to vector<1x96xf32>
    %144 = vector.broadcast %143 : vector<1x96xf32> to vector<32x96xf32>
    %145 = arith.addf %141, %144 : vector<32x96xf32>
    %146 = vector.extract_strided_slice %145 {offsets = [0, 0], sizes = [32, 32], strides = [1, 1]} : vector<32x96xf32> to vector<32x32xf32>
    %147 = vector.extract_strided_slice %145 {offsets = [0, 32], sizes = [32, 32], strides = [1, 1]} : vector<32x96xf32> to vector<32x32xf32>
    %148 = vector.extract_strided_slice %145 {offsets = [0, 64], sizes = [32, 32], strides = [1, 1]} : vector<32x96xf32> to vector<32x32xf32>
    %cst_76 = arith.constant dense<0.000000e+00> : vector<32x32xf32>
    %149 = tpu.matmul %146, %147, %cst_76 {dimension_numbers = #tpu.dot_dimension_numbers<[1], [1], [0], [0], [0, 0, 1, 0], [], []>} : vector<32x32xf32>, vector<32x32xf32>, vector<32x32xf32> -> vector<32x32xf32>
    %cst_77 = arith.constant 0.176776692 : f32
    %150 = vector.broadcast %cst_77 : f32 to vector<32x32xf32>
    %151 = arith.mulf %149, %150 : vector<32x32xf32>
    %152 = arith.addf %151, %25 : vector<32x32xf32>
    %cst_78 = arith.constant dense<0xFF800000> : vector<32xf32>
    %153 = vector.multi_reduction <maximumf>, %152, %cst_78 [1] : vector<32x32xf32> to vector<32xf32>
    %154 = vector.shape_cast %153 : vector<32xf32> to vector<32x1xf32>
    %155 = vector.broadcast %154 : vector<32x1xf32> to vector<32x32xf32>
    %156 = arith.subf %152, %155 : vector<32x32xf32>
    %157 = math.exp %156 : vector<32x32xf32>
    %cst_79 = arith.constant dense<0.000000e+00> : vector<32xf32>
    %158 = vector.multi_reduction <add>, %157, %cst_79 [1] : vector<32x32xf32> to vector<32xf32>
    %159 = vector.shape_cast %158 : vector<32xf32> to vector<32x1xf32>
    %160 = tpu.reciprocal %159 {approx = true} : vector<32x1xf32> -> vector<32x1xf32>
    %161 = vector.broadcast %160 : vector<32x1xf32> to vector<32x32xf32>
    %162 = arith.mulf %157, %161 : vector<32x32xf32>
    %cst_80 = arith.constant dense<0.000000e+00> : vector<32x32xf32>
    %163 = tpu.matmul %162, %148, %cst_80 {dimension_numbers = #tpu.dot_dimension_numbers<[1], [0], [0], [1], [0, 0, 1, 1], [], []>} : vector<32x32xf32>, vector<32x32xf32>, vector<32x32xf32> -> vector<32x32xf32>
    %c1_81 = arith.constant 1 : index
    %c0_82 = arith.constant 0 : index
    %c0_83 = arith.constant 0 : index
    %164 = vector.load %arg8[%c1_81, %c0_82, %c0_83] : memref<2x32x32xf32, #tpu.memory_space<vmem>>, vector<1x32x32xf32>
    %165 = vector.shape_cast %164 : vector<1x32x32xf32> to vector<32x32xf32>
    %cst_84 = arith.constant dense<0.000000e+00> : vector<32x32xf32>
    %166 = tpu.matmul %163, %165, %cst_84 {dimension_numbers = #tpu.dot_dimension_numbers<[1], [0], [0], [1], [0, 0, 1, 1], [], []>} : vector<32x32xf32>, vector<32x32xf32>, vector<32x32xf32> -> vector<32x32xf32>
    %c1_85 = arith.constant 1 : index
    %c0_86 = arith.constant 0 : index
    %c0_87 = arith.constant 0 : index
    %167 = vector.load %arg9[%c1_85, %c0_86, %c0_87] : memref<2x1x32xf32, #tpu.memory_space<vmem>>, vector<1x1x32xf32>
    %168 = vector.shape_cast %167 : vector<1x1x32xf32> to vector<1x32xf32>
    %169 = vector.broadcast %168 : vector<1x32xf32> to vector<32x32xf32>
    %170 = arith.addf %166, %169 : vector<32x32xf32>
    %171 = arith.addf %138, %170 : vector<32x32xf32>
    %c1_88 = arith.constant 1 : index
    %c0_89 = arith.constant 0 : index
    %c0_90 = arith.constant 0 : index
    %172 = vector.load %arg10[%c1_88, %c0_89, %c0_90] : memref<2x1x32xf32, #tpu.memory_space<vmem>>, vector<1x1x32xf32>
    %173 = vector.shape_cast %172 : vector<1x1x32xf32> to vector<1x32xf32>
    %c1_91 = arith.constant 1 : index
    %c0_92 = arith.constant 0 : index
    %c0_93 = arith.constant 0 : index
    %174 = vector.load %arg11[%c1_91, %c0_92, %c0_93] : memref<2x1x32xf32, #tpu.memory_space<vmem>>, vector<1x1x32xf32>
    %175 = vector.shape_cast %174 : vector<1x1x32xf32> to vector<1x32xf32>
    %cst_94 = arith.constant dense<0.000000e+00> : vector<32xf32>
    %176 = vector.multi_reduction <add>, %171, %cst_94 [1] : vector<32x32xf32> to vector<32xf32>
    %177 = vector.shape_cast %176 : vector<32xf32> to vector<32x1xf32>
    %cst_95 = arith.constant 3.200000e+01 : f32
    %178 = vector.broadcast %cst_95 : f32 to vector<32x1xf32>
    %179 = arith.divf %177, %178 : vector<32x1xf32>
    %180 = vector.broadcast %179 : vector<32x1xf32> to vector<32x32xf32>
    %181 = arith.subf %171, %180 : vector<32x32xf32>
    %182 = arith.mulf %181, %181 : vector<32x32xf32>
    %cst_96 = arith.constant dense<0.000000e+00> : vector<32xf32>
    %183 = vector.multi_reduction <add>, %182, %cst_96 [1] : vector<32x32xf32> to vector<32xf32>
    %184 = vector.shape_cast %183 : vector<32xf32> to vector<32x1xf32>
    %cst_97 = arith.constant 3.200000e+01 : f32
    %185 = vector.broadcast %cst_97 : f32 to vector<32x1xf32>
    %186 = arith.divf %184, %185 : vector<32x1xf32>
    %187 = vector.broadcast %179 : vector<32x1xf32> to vector<32x32xf32>
    %188 = arith.subf %171, %187 : vector<32x32xf32>
    %cst_98 = arith.constant 9.99999996E-13 : f32
    %189 = vector.broadcast %cst_98 : f32 to vector<32x1xf32>
    %190 = arith.addf %186, %189 : vector<32x1xf32>
    %191 = math.rsqrt %190 : vector<32x1xf32>
    %192 = vector.broadcast %191 : vector<32x1xf32> to vector<32x32xf32>
    %193 = arith.mulf %188, %192 : vector<32x32xf32>
    %194 = vector.broadcast %173 : vector<1x32xf32> to vector<32x32xf32>
    %195 = arith.mulf %193, %194 : vector<32x32xf32>
    %196 = vector.broadcast %175 : vector<1x32xf32> to vector<32x32xf32>
    %197 = arith.addf %195, %196 : vector<32x32xf32>
    %c1_99 = arith.constant 1 : index
    %c0_100 = arith.constant 0 : index
    %c0_101 = arith.constant 0 : index
    %198 = vector.load %arg12[%c1_99, %c0_100, %c0_101] : memref<2x32x128xf32, #tpu.memory_space<vmem>>, vector<1x32x128xf32>
    %199 = vector.shape_cast %198 : vector<1x32x128xf32> to vector<32x128xf32>
    %cst_102 = arith.constant dense<0.000000e+00> : vector<32x128xf32>
    %200 = tpu.matmul %197, %199, %cst_102 {dimension_numbers = #tpu.dot_dimension_numbers<[1], [0], [0], [1], [0, 0, 1, 1], [], []>} : vector<32x32xf32>, vector<32x128xf32>, vector<32x128xf32> -> vector<32x128xf32>
    %c1_103 = arith.constant 1 : index
    %c0_104 = arith.constant 0 : index
    %c0_105 = arith.constant 0 : index
    %201 = vector.load %arg13[%c1_103, %c0_104, %c0_105] : memref<2x1x128xf32, #tpu.memory_space<vmem>>, vector<1x1x128xf32>
    %202 = vector.shape_cast %201 : vector<1x1x128xf32> to vector<1x128xf32>
    %203 = vector.broadcast %202 : vector<1x128xf32> to vector<32x128xf32>
    %204 = arith.addf %200, %203 : vector<32x128xf32>
    %205 = arith.mulf %204, %204 : vector<32x128xf32>
    %206 = arith.mulf %204, %205 : vector<32x128xf32>
    %cst_106 = arith.constant 4.471500e-02 : f32
    %207 = vector.broadcast %cst_106 : f32 to vector<32x128xf32>
    %208 = arith.mulf %207, %206 : vector<32x128xf32>
    %209 = arith.addf %204, %208 : vector<32x128xf32>
    %cst_107 = arith.constant 0.797884583 : f32
    %210 = vector.broadcast %cst_107 : f32 to vector<32x128xf32>
    %211 = arith.mulf %210, %209 : vector<32x128xf32>
    %212 = math.tanh %211 : vector<32x128xf32>
    %cst_108 = arith.constant 1.000000e+00 : f32
    %213 = vector.broadcast %cst_108 : f32 to vector<32x128xf32>
    %214 = arith.addf %213, %212 : vector<32x128xf32>
    %cst_109 = arith.constant 5.000000e-01 : f32
    %215 = vector.broadcast %cst_109 : f32 to vector<32x128xf32>
    %216 = arith.mulf %215, %214 : vector<32x128xf32>
    %217 = arith.mulf %204, %216 : vector<32x128xf32>
    %c1_110 = arith.constant 1 : index
    %c0_111 = arith.constant 0 : index
    %c0_112 = arith.constant 0 : index
    %218 = vector.load %arg14[%c1_110, %c0_111, %c0_112] : memref<2x128x32xf32, #tpu.memory_space<vmem>>, vector<1x128x32xf32>
    %219 = vector.shape_cast %218 : vector<1x128x32xf32> to vector<128x32xf32>
    %cst_113 = arith.constant dense<0.000000e+00> : vector<32x32xf32>
    %220 = tpu.matmul %217, %219, %cst_113 {dimension_numbers = #tpu.dot_dimension_numbers<[1], [0], [0], [1], [0, 0, 1, 1], [], []>} : vector<32x128xf32>, vector<128x32xf32>, vector<32x32xf32> -> vector<32x32xf32>
    %c1_114 = arith.constant 1 : index
    %c0_115 = arith.constant 0 : index
    %c0_116 = arith.constant 0 : index
    %221 = vector.load %arg15[%c1_114, %c0_115, %c0_116] : memref<2x1x32xf32, #tpu.memory_space<vmem>>, vector<1x1x32xf32>
    %222 = vector.shape_cast %221 : vector<1x1x32xf32> to vector<1x32xf32>
    %223 = vector.broadcast %222 : vector<1x32xf32> to vector<32x32xf32>
    %224 = arith.addf %220, %223 : vector<32x32xf32>
    %225 = arith.addf %197, %224 : vector<32x32xf32>
    %c1_117 = arith.constant 1 : index
    %c0_118 = arith.constant 0 : index
    %c0_119 = arith.constant 0 : index
    %226 = vector.load %arg16[%c1_117, %c0_118, %c0_119] : memref<2x1x32xf32, #tpu.memory_space<vmem>>, vector<1x1x32xf32>
    %227 = vector.shape_cast %226 : vector<1x1x32xf32> to vector<1x32xf32>
    %c1_120 = arith.constant 1 : index
    %c0_121 = arith.constant 0 : index
    %c0_122 = arith.constant 0 : index
    %228 = vector.load %arg17[%c1_120, %c0_121, %c0_122] : memref<2x1x32xf32, #tpu.memory_space<vmem>>, vector<1x1x32xf32>
    %229 = vector.shape_cast %228 : vector<1x1x32xf32> to vector<1x32xf32>
    %cst_123 = arith.constant dense<0.000000e+00> : vector<32xf32>
    %230 = vector.multi_reduction <add>, %225, %cst_123 [1] : vector<32x32xf32> to vector<32xf32>
    %231 = vector.shape_cast %230 : vector<32xf32> to vector<32x1xf32>
    %cst_124 = arith.constant 3.200000e+01 : f32
    %232 = vector.broadcast %cst_124 : f32 to vector<32x1xf32>
    %233 = arith.divf %231, %232 : vector<32x1xf32>
    %234 = vector.broadcast %233 : vector<32x1xf32> to vector<32x32xf32>
    %235 = arith.subf %225, %234 : vector<32x32xf32>
    %236 = arith.mulf %235, %235 : vector<32x32xf32>
    %cst_125 = arith.constant dense<0.000000e+00> : vector<32xf32>
    %237 = vector.multi_reduction <add>, %236, %cst_125 [1] : vector<32x32xf32> to vector<32xf32>
    %238 = vector.shape_cast %237 : vector<32xf32> to vector<32x1xf32>
    %cst_126 = arith.constant 3.200000e+01 : f32
    %239 = vector.broadcast %cst_126 : f32 to vector<32x1xf32>
    %240 = arith.divf %238, %239 : vector<32x1xf32>
    %241 = vector.broadcast %233 : vector<32x1xf32> to vector<32x32xf32>
    %242 = arith.subf %225, %241 : vector<32x32xf32>
    %cst_127 = arith.constant 9.99999996E-13 : f32
    %243 = vector.broadcast %cst_127 : f32 to vector<32x1xf32>
    %244 = arith.addf %240, %243 : vector<32x1xf32>
    %245 = math.rsqrt %244 : vector<32x1xf32>
    %246 = vector.broadcast %245 : vector<32x1xf32> to vector<32x32xf32>
    %247 = arith.mulf %242, %246 : vector<32x32xf32>
    %248 = vector.broadcast %227 : vector<1x32xf32> to vector<32x32xf32>
    %249 = arith.mulf %247, %248 : vector<32x32xf32>
    %250 = vector.broadcast %229 : vector<1x32xf32> to vector<32x32xf32>
    %251 = arith.addf %249, %250 : vector<32x32xf32>
    %c0_128 = arith.constant 0 : index
    %c0_129 = arith.constant 0 : index
    %252 = vector.load %arg3[%c0_128, %c0_129] : memref<4x32xf32, #tpu.memory_space<vmem>>, vector<4x32xf32>
    %cst_130 = arith.constant dense<0.000000e+00> : vector<4x32xf32>
    %253 = tpu.matmul %252, %251, %cst_130 {dimension_numbers = #tpu.dot_dimension_numbers<[1], [0], [0], [1], [0, 0, 1, 1], [], []>} : vector<4x32xf32>, vector<32x32xf32>, vector<4x32xf32> -> vector<4x32xf32>
    %c0_131 = arith.constant 0 : index
    %c0_132 = arith.constant 0 : index
    %254 = vector.load %arg18[%c0_131, %c0_132] : memref<1x32xf32, #tpu.memory_space<vmem>>, vector<1x32xf32>
    %c0_133 = arith.constant 0 : index
    %c0_134 = arith.constant 0 : index
    %255 = vector.load %arg19[%c0_133, %c0_134] : memref<1x32xf32, #tpu.memory_space<vmem>>, vector<1x32xf32>
    %cst_135 = arith.constant dense<0.000000e+00> : vector<4xf32>
    %256 = vector.multi_reduction <add>, %253, %cst_135 [1] : vector<4x32xf32> to vector<4xf32>
    %257 = vector.shape_cast %256 : vector<4xf32> to vector<4x1xf32>
    %cst_136 = arith.constant 3.200000e+01 : f32
    %258 = vector.broadcast %cst_136 : f32 to vector<4x1xf32>
    %259 = arith.divf %257, %258 : vector<4x1xf32>
    %260 = vector.broadcast %259 : vector<4x1xf32> to vector<4x32xf32>
    %261 = arith.subf %253, %260 : vector<4x32xf32>
    %262 = arith.mulf %261, %261 : vector<4x32xf32>
    %cst_137 = arith.constant dense<0.000000e+00> : vector<4xf32>
    %263 = vector.multi_reduction <add>, %262, %cst_137 [1] : vector<4x32xf32> to vector<4xf32>
    %264 = vector.shape_cast %263 : vector<4xf32> to vector<4x1xf32>
    %cst_138 = arith.constant 3.200000e+01 : f32
    %265 = vector.broadcast %cst_138 : f32 to vector<4x1xf32>
    %266 = arith.divf %264, %265 : vector<4x1xf32>
    %267 = vector.broadcast %259 : vector<4x1xf32> to vector<4x32xf32>
    %268 = arith.subf %253, %267 : vector<4x32xf32>
    %cst_139 = arith.constant 9.99999996E-13 : f32
    %269 = vector.broadcast %cst_139 : f32 to vector<4x1xf32>
    %270 = arith.addf %266, %269 : vector<4x1xf32>
    %271 = math.rsqrt %270 : vector<4x1xf32>
    %272 = vector.broadcast %271 : vector<4x1xf32> to vector<4x32xf32>
    %273 = arith.mulf %268, %272 : vector<4x32xf32>
    %274 = vector.broadcast %254 : vector<1x32xf32> to vector<4x32xf32>
    %275 = arith.mulf %273, %274 : vector<4x32xf32>
    %276 = vector.broadcast %255 : vector<1x32xf32> to vector<4x32xf32>
    %277 = arith.addf %275, %276 : vector<4x32xf32>
    %278 = vector.extract_strided_slice %277 {offsets = [0, 0], sizes = [2, 32], strides = [1, 1]} : vector<4x32xf32> to vector<2x32xf32>
    %279 = vector.extract_strided_slice %277 {offsets = [2, 0], sizes = [2, 32], strides = [1, 1]} : vector<4x32xf32> to vector<2x32xf32>
    %c0_140 = arith.constant 0 : index
    %c0_141 = arith.constant 0 : index
    %280 = vector.load %arg20[%c0_140, %c0_141] : memref<32x32xf32, #tpu.memory_space<vmem>>, vector<32x32xf32>
    %cst_142 = arith.constant dense<0.000000e+00> : vector<2x32xf32>
    %281 = tpu.matmul %278, %280, %cst_142 {dimension_numbers = #tpu.dot_dimension_numbers<[1], [0], [0], [1], [0, 0, 1, 1], [], []>} : vector<2x32xf32>, vector<32x32xf32>, vector<2x32xf32> -> vector<2x32xf32>
    %c0_143 = arith.constant 0 : index
    %c0_144 = arith.constant 0 : index
    %282 = vector.load %arg21[%c0_143, %c0_144] : memref<1x32xf32, #tpu.memory_space<vmem>>, vector<1x32xf32>
    %283 = vector.broadcast %282 : vector<1x32xf32> to vector<2x32xf32>
    %284 = arith.addf %281, %283 : vector<2x32xf32>
    %c0_145 = arith.constant 0 : index
    %c0_146 = arith.constant 0 : index
    %285 = vector.load %arg22[%c0_145, %c0_146] : memref<32x32xf32, #tpu.memory_space<vmem>>, vector<32x32xf32>
    %cst_147 = arith.constant dense<0.000000e+00> : vector<2x32xf32>
    %286 = tpu.matmul %279, %285, %cst_147 {dimension_numbers = #tpu.dot_dimension_numbers<[1], [0], [0], [1], [0, 0, 1, 1], [], []>} : vector<2x32xf32>, vector<32x32xf32>, vector<2x32xf32> -> vector<2x32xf32>
    %c0_148 = arith.constant 0 : index
    %c0_149 = arith.constant 0 : index
    %287 = vector.load %arg23[%c0_148, %c0_149] : memref<1x32xf32, #tpu.memory_space<vmem>>, vector<1x32xf32>
    %288 = vector.broadcast %287 : vector<1x32xf32> to vector<2x32xf32>
    %289 = arith.addf %286, %288 : vector<2x32xf32>
    %290 = arith.mulf %284, %284 : vector<2x32xf32>
    %cst_150 = arith.constant dense<0.000000e+00> : vector<2xf32>
    %291 = vector.multi_reduction <add>, %290, %cst_150 [1] : vector<2x32xf32> to vector<2xf32>
    %292 = vector.shape_cast %291 : vector<2xf32> to vector<2x1xf32>
    %293 = math.sqrt %292 : vector<2x1xf32>
    %cst_151 = arith.constant 9.99999996E-13 : f32
    %294 = vector.broadcast %cst_151 : f32 to vector<2x1xf32>
    %295 = arith.maximumf %293, %294 : vector<2x1xf32>
    %296 = tpu.reciprocal %295 {approx = true} : vector<2x1xf32> -> vector<2x1xf32>
    %297 = vector.broadcast %296 : vector<2x1xf32> to vector<2x32xf32>
    %298 = arith.mulf %284, %297 : vector<2x32xf32>
    %299 = arith.mulf %289, %289 : vector<2x32xf32>
    %cst_152 = arith.constant dense<0.000000e+00> : vector<2xf32>
    %300 = vector.multi_reduction <add>, %299, %cst_152 [1] : vector<2x32xf32> to vector<2xf32>
    %301 = vector.shape_cast %300 : vector<2xf32> to vector<2x1xf32>
    %302 = math.sqrt %301 : vector<2x1xf32>
    %cst_153 = arith.constant 9.99999996E-13 : f32
    %303 = vector.broadcast %cst_153 : f32 to vector<2x1xf32>
    %304 = arith.maximumf %302, %303 : vector<2x1xf32>
    %305 = tpu.reciprocal %304 {approx = true} : vector<2x1xf32> -> vector<2x1xf32>
    %306 = vector.broadcast %305 : vector<2x1xf32> to vector<2x32xf32>
    %307 = arith.mulf %289, %306 : vector<2x32xf32>
    %c0_154 = arith.constant 0 : index
    %c0_155 = arith.constant 0 : index
    %308 = vector.load %arg24[%c0_154, %c0_155] : memref<1x1xf32, #tpu.memory_space<vmem>>, vector<1x1xf32>
    %309 = vector.extract %308[0, 0] : f32 from vector<1x1xf32>
    %310 = math.exp %309 : f32
    %cst_156 = arith.constant dense<0.000000e+00> : vector<2x2xf32>
    %311 = tpu.matmul %298, %307, %cst_156 {dimension_numbers = #tpu.dot_dimension_numbers<[1], [1], [0], [0], [0, 0, 1, 0], [], []>} : vector<2x32xf32>, vector<2x32xf32>, vector<2x2xf32> -> vector<2x2xf32>
    %312 = vector.broadcast %310 : f32 to vector<2x2xf32>
    %313 = arith.mulf %311, %312 : vector<2x2xf32>
    %c0_157 = arith.constant 0 : index
    %c0_158 = arith.constant 0 : index
    %314 = vector.load %arg25[%c0_157, %c0_158] : memref<2x2xf32, #tpu.memory_space<vmem>>, vector<2x2xf32>
    tpu.vector_store %arg25[%c0_157, %c0_158], %313 {strides = array<i32>} : memref<2x2xf32, #tpu.memory_space<vmem>>, vector<2x2xf32>,
    %c0_159 = arith.constant 0 : index
    %c0_160 = arith.constant 0 : index
    %315 = vector.load %arg26[%c0_159, %c0_160] : memref<2x32xf32, #tpu.memory_space<vmem>>, vector<2x32xf32>
    tpu.vector_store %arg26[%c0_159, %c0_160], %298 {strides = array<i32>} : memref<2x32xf32, #tpu.memory_space<vmem>>, vector<2x32xf32>,
    %c0_161 = arith.constant 0 : index
    %c0_162 = arith.constant 0 : index
    %316 = vector.load %arg27[%c0_161, %c0_162] : memref<2x32xf32, #tpu.memory_space<vmem>>, vector<2x32xf32>
    tpu.vector_store %arg27[%c0_161, %c0_162], %307 {strides = array<i32>} : memref<2x32xf32, #tpu.memory_space<vmem>>, vector<2x32xf32>,
    return
  }
  func.func @transform_0(%arg0: i32) -> (i32, i32) {
    %c0_i32 = arith.constant 0 : i32
    %c0_i32_0 = arith.constant 0 : i32
    %c0_i32_1 = arith.constant 0 : i32
    return %c0_i32, %c0_i32_0 : i32, i32
  }
  func.func @transform_1(%arg0: i32) -> (i32, i32) {
    %c0_i32 = arith.constant 0 : i32
    %c0_i32_0 = arith.constant 0 : i32
    %c0_i32_1 = arith.constant 0 : i32
    return %c0_i32, %c0_i32_0 : i32, i32
  }
  func.func @transform_2(%arg0: i32) -> (i32, i32) {
    %c0_i32 = arith.constant 0 : i32
    %c0_i32_0 = arith.constant 0 : i32
    %c0_i32_1 = arith.constant 0 : i32
    return %c0_i32, %c0_i32_0 : i32, i32
  }
  func.func @transform_3(%arg0: i32) -> (i32, i32) {
    %c0_i32 = arith.constant 0 : i32
    %c0_i32_0 = arith.constant 0 : i32
    %c0_i32_1 = arith.constant 0 : i32
    return %c0_i32, %c0_i32_0 : i32, i32
  }
  func.func @transform_4(%arg0: i32) -> (i32, i32) {
    %c0_i32 = arith.constant 0 : i32
    %c0_i32_0 = arith.constant 0 : i32
    %c0_i32_1 = arith.constant 0 : i32
    return %c0_i32, %c0_i32_0 : i32, i32
  }
  func.func @transform_5(%arg0: i32) -> (i32, i32, i32) {
    %c0_i32 = arith.constant 0 : i32
    %c0_i32_0 = arith.constant 0 : i32
    %c0_i32_1 = arith.constant 0 : i32
    %c0_i32_2 = arith.constant 0 : i32
    return %c0_i32, %c0_i32_0, %c0_i32_1 : i32, i32, i32
  }
  func.func @transform_6(%arg0: i32) -> (i32, i32, i32) {
    %c0_i32 = arith.constant 0 : i32
    %c0_i32_0 = arith.constant 0 : i32
    %c0_i32_1 = arith.constant 0 : i32
    %c0_i32_2 = arith.constant 0 : i32
    return %c0_i32, %c0_i32_0, %c0_i32_1 : i32, i32, i32
  }
  func.func @transform_7(%arg0: i32) -> (i32, i32, i32) {
    %c0_i32 = arith.constant 0 : i32
    %c0_i32_0 = arith.constant 0 : i32
    %c0_i32_1 = arith.constant 0 : i32
    %c0_i32_2 = arith.constant 0 : i32
    return %c0_i32, %c0_i32_0, %c0_i32_1 : i32, i32, i32
  }
  func.func @transform_8(%arg0: i32) -> (i32, i32, i32) {
    %c0_i32 = arith.constant 0 : i32
    %c0_i32_0 = arith.constant 0 : i32
    %c0_i32_1 = arith.constant 0 : i32
    %c0_i32_2 = arith.constant 0 : i32
    return %c0_i32, %c0_i32_0, %c0_i32_1 : i32, i32, i32
  }
  func.func @transform_9(%arg0: i32) -> (i32, i32, i32) {
    %c0_i32 = arith.constant 0 : i32
    %c0_i32_0 = arith.constant 0 : i32
    %c0_i32_1 = arith.constant 0 : i32
    %c0_i32_2 = arith.constant 0 : i32
    return %c0_i32, %c0_i32_0, %c0_i32_1 : i32, i32, i32
  }
  func.func @transform_10(%arg0: i32) -> (i32, i32, i32) {
    %c0_i32 = arith.constant 0 : i32
    %c0_i32_0 = arith.constant 0 : i32
    %c0_i32_1 = arith.constant 0 : i32
    %c0_i32_2 = arith.constant 0 : i32
    return %c0_i32, %c0_i32_0, %c0_i32_1 : i32, i32, i32
  }
  func.func @transform_11(%arg0: i32) -> (i32, i32, i32) {
    %c0_i32 = arith.constant 0 : i32
    %c0_i32_0 = arith.constant 0 : i32
    %c0_i32_1 = arith.constant 0 : i32
    %c0_i32_2 = arith.constant 0 : i32
    return %c0_i32, %c0_i32_0, %c0_i32_1 : i32, i32, i32
  }
  func.func @transform_12(%arg0: i32) -> (i32, i32, i32) {
    %c0_i32 = arith.constant 0 : i32
    %c0_i32_0 = arith.constant 0 : i32
    %c0_i32_1 = arith.constant 0 : i32
    %c0_i32_2 = arith.constant 0 : i32
    return %c0_i32, %c0_i32_0, %c0_i32_1 : i32, i32, i32
  }
  func.func @transform_13(%arg0: i32) -> (i32, i32, i32) {
    %c0_i32 = arith.constant 0 : i32
    %c0_i32_0 = arith.constant 0 : i32
    %c0_i32_1 = arith.constant 0 : i32
    %c0_i32_2 = arith.constant 0 : i32
    return %c0_i32, %c0_i32_0, %c0_i32_1 : i32, i32, i32
  }
  func.func @transform_14(%arg0: i32) -> (i32, i32, i32) {
    %c0_i32 = arith.constant 0 : i32
    %c0_i32_0 = arith.constant 0 : i32
    %c0_i32_1 = arith.constant 0 : i32
    %c0_i32_2 = arith.constant 0 : i32
    return %c0_i32, %c0_i32_0, %c0_i32_1 : i32, i32, i32
  }
  func.func @transform_15(%arg0: i32) -> (i32, i32, i32) {
    %c0_i32 = arith.constant 0 : i32
    %c0_i32_0 = arith.constant 0 : i32
    %c0_i32_1 = arith.constant 0 : i32
    %c0_i32_2 = arith.constant 0 : i32
    return %c0_i32, %c0_i32_0, %c0_i32_1 : i32, i32, i32
  }
  func.func @transform_16(%arg0: i32) -> (i32, i32, i32) {
    %c0_i32 = arith.constant 0 : i32
    %c0_i32_0 = arith.constant 0 : i32
    %c0_i32_1 = arith.constant 0 : i32
    %c0_i32_2 = arith.constant 0 : i32
    return %c0_i32, %c0_i32_0, %c0_i32_1 : i32, i32, i32
  }
  func.func @transform_17(%arg0: i32) -> (i32, i32) {
    %c0_i32 = arith.constant 0 : i32
    %c0_i32_0 = arith.constant 0 : i32
    %c0_i32_1 = arith.constant 0 : i32
    return %c0_i32, %c0_i32_0 : i32, i32
  }
  func.func @transform_18(%arg0: i32) -> (i32, i32) {
    %c0_i32 = arith.constant 0 : i32
    %c0_i32_0 = arith.constant 0 : i32
    %c0_i32_1 = arith.constant 0 : i32
    return %c0_i32, %c0_i32_0 : i32, i32
  }
  func.func @transform_19(%arg0: i32) -> (i32, i32) {
    %c0_i32 = arith.constant 0 : i32
    %c0_i32_0 = arith.constant 0 : i32
    %c0_i32_1 = arith.constant 0 : i32
    return %c0_i32, %c0_i32_0 : i32, i32
  }
  func.func @transform_20(%arg0: i32) -> (i32, i32) {
    %c0_i32 = arith.constant 0 : i32
    %c0_i32_0 = arith.constant 0 : i32
    %c0_i32_1 = arith.constant 0 : i32
    return %c0_i32, %c0_i32_0 : i32, i32
  }
  func.func @transform_21(%arg0: i32) -> (i32, i32) {
    %c0_i32 = arith.constant 0 : i32
    %c0_i32_0 = arith.constant 0 : i32
    %c0_i32_1 = arith.constant 0 : i32
    return %c0_i32, %c0_i32_0 : i32, i32
  }
  func.func @transform_22(%arg0: i32) -> (i32, i32) {
    %c0_i32 = arith.constant 0 : i32
    %c0_i32_0 = arith.constant 0 : i32
    %c0_i32_1 = arith.constant 0 : i32
    return %c0_i32, %c0_i32_0 : i32, i32
  }
  func.func @transform_23(%arg0: i32) -> (i32, i32) {
    %c0_i32 = arith.constant 0 : i32
    %c0_i32_0 = arith.constant 0 : i32
    %c0_i32_1 = arith.constant 0 : i32
    return %c0_i32, %c0_i32_0 : i32, i32
  }
  func.func @transform_24(%arg0: i32) -> (i32, i32) {
    %c0_i32 = arith.constant 0 : i32
    %c0_i32_0 = arith.constant 0 : i32
    %c0_i32_1 = arith.constant 0 : i32
    return %c0_i32, %c0_i32_0 : i32, i32
  }
  func.func @transform_25(%arg0: i32) -> (i32, i32) {
    %c0_i32 = arith.constant 0 : i32
    %c0_i32_0 = arith.constant 0 : i32
    %c0_i32_1 = arith.constant 0 : i32
    return %c0_i32, %c0_i32_0 : i32, i32
  }
  func.func @transform_26(%arg0: i32) -> (i32, i32) {
    %c0_i32 = arith.constant 0 : i32
    %c0_i32_0 = arith.constant 0 : i32
    %c0_i32_1 = arith.constant 0 : i32
    return %c0_i32, %c0_i32_0 : i32, i32
  }
}

</mosaic_0001>

<bundles_post_ra>
// kernel: eq.27
= control target key start
LH: loop header
LB: loop body
LE: loop exit
PB: predicated region body
PF: predicated region fallthrough
CT: control target
= control target key end

     0   :  { %vm7_vm0 = vcmask 64512   ;;  %s37_s8 = smov 8   ;;  %s38_s9 = smov 16   ;;  %vm13_vm1 = vcmask 261312   ;;  %vm19_vm2 = vcmask 195712   ;;  %vm25_vm3 = vcmask 130112   ;;  %s55_s0 = inlined_call_operand.vmem [shape: s32[4,8], index: 0, kind: input, shape index: {}]   ;;  %s56_s1 = inlined_call_operand.vmem [shape: s32[32], index: 1, kind: output, shape index: {}]  }
   0x1   :  { %v4_v0 = vld [vmem:[%s55_s0] sm:$0xf]  ;;  %s36_s0 = smov 24  }
   0x2   :  { %5 = vst [vmem:[#allocation1] sm:$0xf] %v4_v0 }
   0x9   :  { %v10_v1 = vld [vmem:[#allocation1 + $0x3] sm:$0x1]   ;;  %v22_v2 = vld [vmem:[#allocation1 + $0x1] sm:$0x1]   ;;  %v6_v3 = vld [vmem:[#allocation1] sm:$0x1]  }
   0xa   :  { %11 = vrot.lane.b32.xlu0 %v10_v1, %s36_s0  ;;  %23 = vrot.lane.b32.xlu1 %v22_v2, %s37_s8  ;;  %v16_v4 = vld [vmem:[#allocation1 + $0x2] sm:$0x1]   ;;  %8 = vst.msk [vmem:[#allocation0] sm:$0x1] %vm7_vm0, %v6_v3  }
   0xe   :  { %17 = vrot.lane.b32.xlu0 %v16_v4, %s38_s9 }
  0x7c   :  { %v12_v5 = vpop.permute.xlu0 %11   ;;  %v24_v6 = vpop.permute.xlu1 %23  }
  0x7d   :  { %14 = vst.msk [vmem:[#allocation0] sm:$0x1] %vm13_vm1, %v12_v5  }
  0x80   :  { %v18_v7 = vpop.permute.xlu0 %17  }
  0x81   :  { %20 = vst.msk [vmem:[#allocation0] sm:$0x1] %vm19_vm2, %v18_v7  }
  0x82   :  { %26 = vst.msk [vmem:[#allocation0] sm:$0x1] %vm25_vm3, %v24_v6  }
  0x89   :  { %v30_v8 = vld [vmem:[#allocation0] sm:$0x1] }
  0x8a   :  { %32 = vst [vmem:[%s56_s1] sm:$0x1] %v30_v8 }

// kernel: kobert_clip_forward.1
= control target key start
LH: loop header
LB: loop body
LE: loop exit
PB: predicated region body
PF: predicated region fallthrough
CT: control target
= control target key end

     0   :  { %s4099_s0 = inlined_call_operand.vmem [shape: f32[32,32], index: 0, kind: input, shape index: {}]   ;;  %s4100_s1 = inlined_call_operand.vmem [shape: f32[32,32], index: 1, kind: input, shape index: {}]   ;;  %s4101_s2 = inlined_call_operand.vmem [shape: f32[4,32], index: 2, kind: input, shape index: {}]   ;;  %s4102_s3 = inlined_call_operand.vmem [shape: f32[1,32], index: 3, kind: input, shape index: {}, may-alias: {3,17}]   ;;  %s4103_s4 = inlined_call_operand.vmem [shape: f32[1,32], index: 4, kind: input, shape index: {}, may-alias: {4,18,20,22}]   ;;  %s4104_s5 = inlined_call_operand.vmem [shape: f32[2,32,96], index: 5, kind: input, shape index: {}]   ;;  %s4105_s6 = inlined_call_operand.vmem [shape: f32[2,1,96], index: 6, kind: input, shape index: {}]   ;;  %s4106_s7 = inlined_call_operand.vmem [shape: f32[2,32,32], index: 7, kind: input, shape index: {}]   ;;  %s4107_s8 = inlined_call_operand.vmem [shape: f32[2,1,32], index: 8, kind: input, shape index: {}, may-alias: {8,10,14,16}]   ;;  %s4108_s9 = inlined_call_operand.vmem [shape: f32[2,1,32], index: 9, kind: input, shape index: {}, may-alias: {9,15}]   ;;  %s4109_s10 = inlined_call_operand.vmem [shape: f32[2,1,32], index: 10, kind: input, shape index: {}, may-alias: {8,10,14,16}]   ;;  %s4110_s11 = inlined_call_operand.vmem [shape: f32[2,32,128], index: 11, kind: input, shape index: {}]   ;;  %s4111_s12 = inlined_call_operand.vmem [shape: f32[2,1,128], index: 12, kind: input, shape index: {}]   ;;  %s4112_s13 = inlined_call_operand.vmem [shape: f32[2,128,32], index: 13, kind: input, shape index: {}]   ;;  %s4113_s14 = inlined_call_operand.vmem [shape: f32[2,1,32], index: 14, kind: input, shape index: {}, may-alias: {8,10,14,16}]   ;;  %s4114_s15 = inlined_call_operand.vmem [shape: f32[2,1,32], index: 15, kind: input, shape index: {}, may-alias: {9,15}]   ;;  %s4115_s16 = inlined_call_operand.vmem [shape: f32[2,1,32], index: 16, kind: input, shape index: {}, may-alias: {8,10,14,16}]   ;;  %s4116_s17 = inlined_call_operand.vmem [shape: f32[1,32], index: 17, kind: input, shape index: {}, may-alias: {3,17}]   ;;  %s4117_s18 = inlined_call_operand.vmem [shape: f32[1,32], index: 18, kind: input, shape index: {}, may-alias: {4,18,20,22}]   ;;  %s4118_s19 = inlined_call_operand.hbm [shape: f32[32,32], index: 19, kind: input, shape index: {}]   ;;  %s4119_s20 = inlined_call_operand.vmem [shape: f32[1,32], index: 20, kind: input, shape index: {}, may-alias: {4,18,20,22}]   ;;  %s4120_s21 = inlined_call_operand.hbm [shape: f32[32,32], index: 21, kind: input, shape index: {}]   ;;  %s4121_s22 = inlined_call_operand.vmem [shape: f32[1,32], index: 22, kind: input, shape index: {}, may-alias: {4,18,20,22}]   ;;  %s4122_s23 = inlined_call_operand.<no memory space> [shape: f32[1,1], index: 23, kind: input, shape index: {}]   ;;  %s4123_s24 = inlined_call_operand.hbm [shape: f32[2,2], index: 24, kind: output, shape index: {0}]   ;;  %s4124_s25 = inlined_call_operand.hbm [shape: f32[2,32], index: 25, kind: output, shape index: {1}]   ;;  %s4125_s26 = inlined_call_operand.hbm [shape: f32[2,32], index: 26, kind: output, shape index: {2}]  }
   0x1   :  { %4134 = sst [smem:[#allocation16_spill]] %s4099_s0  ;;  %v32_v0 = vstv %s4122_s23 }
   0x2   :  { %4135 = sst [smem:[#allocation17_spill]] %s4100_s1  ;;  %33 = vst [vmem:[#allocation2] sm:$0x1] %v32_v0 }
   0x3   :  { %4136 = sst [smem:[#allocation18_spill]] %s4101_s2 }
   0x4   :  { %4137 = sst [smem:[#allocation19_spill]] %s4102_s3 }
   0x5   :  { %4138 = sst [smem:[#allocation20_spill]] %s4103_s4 }
   0x6   :  { %4139 = sst [smem:[#allocation21_spill]] %s4104_s5 }
   0x7   :  { %4140 = sst [smem:[#allocation22_spill]] %s4105_s6 }
   0x8   :  { %4141 = sst [smem:[#allocation23_spill]] %s4106_s7 }
   0x9   :  { %4142 = sst [smem:[#allocation24_spill]] %s4107_s8 }
   0xa   :  { %4143 = sst [smem:[#allocation25_spill]] %s4108_s9 }
   0xb   :  { %4144 = sst [smem:[#allocation26_spill]] %s4109_s10 }
   0xc   :  { %34 = vsyncpa [#allocation4], 0 }
   0xd   :  { %35 = vsyncpa [#allocation7], 0 }
   0xe   :  { %36 = vsyncpa [#allocation5], 0 }
   0xf   :  { %37 = vsyncpa [#allocation10], 0  ;;  %s3382_s7 = smov [#allocation3]   ;;  %s3264_s29 = scalar_lea.hbm %s4118_s19, 512 }
  0x10   :  { %s81_s28 = sshll.u32 %s3382_s7, 4  ;;  %p3265_p0 = scmp.ne.s32.totalorder %s4118_s19, %s3264_s29  ;;  %s82_s28 = int_to_ptr.vmem [resolvable:$true] %s81_s28 }
  0x11   :  { %p3268_p1 = scmp.lt.u32.totalorder %s3264_s29, %s4118_s19 }
  0x13   :  { %p3270_p2 = pnand %p3268_p1, %p3265_p0 }
  0x15   :  { %3273 = shalt.err (!%p3270_p2)
}
  0x16   :  { %s3274_s23 = scalar_lea.vmem %s82_s28, 512  ;;  %p3279_p4 = scmp.lt.s32.totalorder %s82_s28, %s82_s28 }
  0x17   :  { %p3275_p3 = scmp.ne.s32.totalorder %s82_s28, %s3274_s23  ;;  %p3280_p5 = scmp.lt.s32.totalorder %s3274_s23, %s3274_s23 }
  0x19   :  { %p3281_p6 = por %p3280_p5, %p3279_p4 }
  0x1b   :  { %p3282_p7 = pnand %p3281_p6, %p3275_p3 }
  0x1d   :  { %3285 = shalt.err (!%p3282_p7)
}
  0x1e   :  { %s3383_s5 = smov 128   ;;  %s3384_s10 = smov 8  }
  0x1f   :  { %87 = dma.hbm_to_vmem [thread:$0]  %s4118_s19, 512, %s82_s28, [#allocation4], %s3383_s5, %s3383_s5, %s3384_s10  }
  0x20   :  { %s3385_s27 = smov [#allocation6]   ;;  %s3286_s4 = scalar_lea.hbm %s4120_s21, 512 }
  0x21   :  { %s95_s3 = sshll.u32 %s3385_s27, 4  ;;  %p3287_p8 = scmp.ne.s32.totalorder %s4120_s21, %s3286_s4  ;;  %s96_s3 = int_to_ptr.vmem [resolvable:$true] %s95_s3 }
  0x22   :  { %p3290_p9 = scmp.lt.u32.totalorder %s3286_s4, %s4120_s21 }
  0x24   :  { %p3292_p10 = pnand %p3290_p9, %p3287_p8 }
  0x26   :  { %3295 = shalt.err (!%p3292_p10)
}
  0x27   :  { %s3296_s2 = scalar_lea.vmem %s96_s3, 512  ;;  %p3301_p12 = scmp.lt.s32.totalorder %s96_s3, %s96_s3 }
  0x28   :  { %p3297_p11 = scmp.ne.s32.totalorder %s96_s3, %s3296_s2  ;;  %p3302_p13 = scmp.lt.s32.totalorder %s3296_s2, %s3296_s2 }
  0x2a   :  { %p3303_p0 = por %p3302_p13, %p3301_p12 }
  0x2c   :  { %p3304_p1 = pnand %p3303_p0, %p3297_p11 }
  0x2e   :  { %3307 = shalt.err (!%p3304_p1)
}
  0x2f   :  { %101 = dma.hbm_to_vmem [thread:$0]  %s4120_s21, 512, %s96_s3, [#allocation7], %s3383_s5, %s3383_s5, %s3384_s10  }
  0x30   :  { %3374 = dma.done.wait [#allocation4], 512  }
  0x31   :  { %3375 = vsyncadd [#allocation4], 4294966784 }
  0x32   :  { %3376 = dma.done.wait [#allocation7], 512  }
  0x33   :  { %3377 = vsyncadd [#allocation7], 4294966784  ;;  %vm118_vm0 = vcmask 261120   ;;  %s4145_s1 = sld [smem:[#allocation16_spill]]  ;;  %s4146_s29 = sld [smem:[#allocation21_spill]]  ;;  %vm3389_vm2 = vmmov 0  }
  0x34   :  { %s4148_s8 = sld [smem:[#allocation20_spill]]  ;;  %s4149_s5 = sld [smem:[#allocation22_spill]]  ;;  %vm3624_vm1 = vmpackc.low %vm118_vm0, %vm118_vm0  ;;  %vm2080_vm3 = vcmask 257024   ;;  %vm2277_vm4 = vcmask 254976  }
  0x35   :  { %s3386_s10 = smov 96   ;;  %s4152_s9 = sld [smem:[#allocation17_spill]] }
  0x36   :  { %s4154_s28 = sld [smem:[#allocation24_spill]]  ;;  %s4155_s2 = sld [smem:[#allocation25_spill]] }
  0x37   :  { %s4156_s6 = sld [smem:[#allocation26_spill]] }
  0x38   :  { %s4157_s7 = sld [smem:[#allocation18_spill]] }
  0x39   :  { %v112_v1 = vld [vmem:[%s4145_s1] sm:$0xff]  ;;  %v114_v2 = vld [vmem:[%s4145_s1 + $0x10] sm:$0xff]  ;;  %v113_v3 = vld [vmem:[%s4145_s1 + $0x8] sm:$0xff] }
  0x3a   :  { %v119_v4 = vsel %vm118_vm0, %v112_v1, 0.0  ;;  %v125_v5 = vsel %vm118_vm0, %v114_v2, 0.0  ;;  %v115_v6 = vld [vmem:[%s4145_s1 + $0x18] sm:$0xff]  ;;  %v122_v7 = vsel %vm118_vm0, %v113_v3, 0.0  ;;  %v196_v29 = vld [vmem:[%s4146_s29] sm:$0xff]  ;;  %v197_v30 = vld [vmem:[%s4146_s29 + $0x8] sm:$0xff] }
  0x3b   :  { %120 = vadd.xlane.f32.xlu0 %v119_v4  ;;  %126 = vadd.xlane.f32.xlu1 %v125_v5  ;;  %v128_v8 = vsel %vm118_vm0, %v115_v6, 0.0  ;;  %v198_v31 = vld [vmem:[%s4146_s29 + $0x10] sm:$0xff]  ;;  %v2938_v32 = vpack.c.bf16 %v197_v30, %v196_v29  ;;  %v199_v33 = vld [vmem:[%s4146_s29 + $0x18] sm:$0xff]  ;;  %s4147_s1 = sld [smem:[#allocation19_spill]]  ;;  %v2437_v50 = vld [vmem:[%s4148_s8] ss:$0 sm:$0xff] }
  0x3c   :  { %v2942_v34 = vpack.c.bf16 %v199_v33, %v198_v31  ;;  %v3654_v30 = vld [vmem:[%s4152_s9 + $0x18] sm:$0xff]  ;;  %s4153_s8 = sld [smem:[#allocation23_spill]] }
  0x3d   :  { %2939 = vmatprep.subr.bf16.mxu0 %v2938_v32 }
  0x3e   :  { %2941 = vmatpush3.bf16.msra.mxu0 %v2938_v32 }
  0x3f   :  { %123 = vadd.xlane.f32.xlu0 %v122_v7  ;;  %129 = vadd.xlane.f32.xlu1 %v128_v8 }
  0x40   :  { %2943 = vmatprep.subr.bf16.mxu0 %v2942_v34 }
  0x41   :  { %v2436_v48 = vld [vmem:[%s4147_s1] ss:$0 sm:$0xff]  ;;  %s3387_s1 = smov 64  }
  0x42   :  { %2945 = vmatpush3.bf16.msra.mxu0 %v2942_v34  ;;  %v3660_v34 = vld [vmem:[%s4152_s9 + $0x10] sm:$0xff] }
  0xc8   :  { %v121_v9 = vpop.xlane.xlu0 %120  ;;  %v127_v10 = vpop.xlane.xlu1 %126 }
  0xc9   :  { %v132_v11 = vmul.f32 0.03125, %v121_v9  ;;  %v134_v12 = vmul.f32 0.03125, %v127_v10 }
  0xcb   :  { %v136_v13 = vsub.f32 %v112_v1, %v132_v11  ;;  %v138_v14 = vsub.f32 %v114_v2, %v134_v12  ;;  %v2438_v1 = vld [vmem:[%s4149_s5] ss:$0 sm:$0xff] }
  0xcc   :  { %v124_v15 = vpop.xlane.xlu0 %123  ;;  %v130_v16 = vpop.xlane.xlu1 %129 }
  0xcd   :  { %v133_v17 = vmul.f32 0.03125, %v124_v15  ;;  %v135_v18 = vmul.f32 0.03125, %v130_v16  ;;  %v140_v19 = vmul.f32 %v136_v13, %v136_v13  ;;  %v142_v20 = vmul.f32 %v138_v14, %v138_v14 }
  0xcf   :  { %v137_v21 = vsub.f32 %v113_v3, %v133_v17  ;;  %v139_v22 = vsub.f32 %v115_v6, %v135_v18  ;;  %v144_v23 = vsel %vm118_vm0, %v140_v19, 0.0  ;;  %v150_v24 = vsel %vm118_vm0, %v142_v20, 0.0 }
  0xd0   :  { %145 = vadd.xlane.f32.xlu0 %v144_v23 }
  0xd1   :  { %v141_v25 = vmul.f32 %v137_v21, %v137_v21  ;;  %v143_v26 = vmul.f32 %v139_v22, %v139_v22 }
  0xd3   :  { %v147_v27 = vsel %vm118_vm0, %v141_v25, 0.0  ;;  %v153_v28 = vsel %vm118_vm0, %v143_v26, 0.0  ;;  %v3647_v25 = vld [vmem:[%s4152_s9] sm:$0xff] }
  0xd4   :  { %151 = vadd.xlane.f32.xlu0 %v150_v24  ;;  %148 = vadd.xlane.f32.xlu1 %v147_v27 }
  0xd8   :  { %154 = vadd.xlane.f32.xlu1 %v153_v28 }
 0x15d   :  { %v146_v35 = vpop.xlane.xlu0 %145 }
 0x15e   :  { %v156_v36 = vmul.f32 0.03125, %v146_v35 }
 0x160   :  { %v160_v37 = vadd.f32 1e-12, %v156_v36 }
 0x161   :  { %v149_v38 = vpop.xlane.xlu1 %148  ;;  %v152_v39 = vpop.xlane.xlu0 %151 }
 0x162   :  { %3164 = vrsqrt.f32 %v160_v37  ;;  %v157_v40 = vmul.f32 0.03125, %v149_v38  ;;  %v158_v41 = vmul.f32 0.03125, %v152_v39 }
 0x164   :  { %v161_v42 = vadd.f32 1e-12, %v157_v40  ;;  %v162_v43 = vadd.f32 1e-12, %v158_v41 }
 0x165   :  { %v155_v44 = vpop.xlane.xlu1 %154 }
 0x166   :  { %3166 = vrsqrt.f32 %v161_v42  ;;  %v159_v45 = vmul.f32 0.03125, %v155_v44 }
 0x167   :  { %3168 = vrsqrt.f32 %v162_v43 }
 0x168   :  { %v163_v46 = vadd.f32 1e-12, %v159_v45 }
 0x16a   :  { %3170 = vrsqrt.f32 %v163_v46 }
 0x16c   :  { %v3165_v47 = vpop.eup %3164 }
 0x16d   :  { %v168_v49 = vmul.f32 %v3165_v47, %v136_v13 }
 0x16f   :  { %v178_v51 = vmul.f32 %v2436_v48, %v168_v49 }
 0x170   :  { %v3167_v52 = vpop.eup %3166 }
 0x171   :  { %v3169_v53 = vpop.eup %3168  ;;  %v3594_v54 = vadd.f32 %v2437_v50, %v178_v51  ;;  %v169_v55 = vmul.f32 %v3167_v52, %v137_v21 }
 0x172   :  { %v170_v56 = vmul.f32 %v3169_v53, %v138_v14 }
 0x173   :  { %2692 = vmatprep.mubr.msk.f32.mxu0 %vm118_vm0, %v3594_v54  ;;  %v179_v57 = vmul.f32 %v2436_v48, %v169_v55 }
 0x174   :  { %v3171_v58 = vpop.eup %3170  ;;  %v180_v59 = vmul.f32 %v2436_v48, %v170_v56 }
 0x175   :  { %v3598_v60 = vadd.f32 %v2437_v50, %v179_v57  ;;  %v171_v61 = vmul.f32 %v3171_v58, %v139_v22  ;;  %v3642_v22 = vld [vmem:[%s4152_s9 + $0x8] sm:$0xff] }
 0x176   :  { %v3600_v62 = vadd.f32 %v2437_v50, %v180_v59 }
 0x177   :  { %2693 = vmatmul.mubr.msk.f32.vlgmr.msra.gmra.mrb[0].mxu0 %vm118_vm0, %v3598_v60  ;;  %v181_v63 = vmul.f32 %v2436_v48, %v171_v61 }
 0x178   :  { %2695 = vmatprep.mubr.msk.f32.mxu0 %vm118_vm0, %v3600_v62 }
 0x179   :  { %v3606_v0 = vadd.f32 %v2437_v50, %v181_v63 }
 0x17b   :  { %2696 = vmatmul.mubr.msk.f32.gmra.mrb[2].mxu0 %vm118_vm0, %v3606_v0 }
 0x24a   :  { %v2694_v2 = vpop.f32.mrb[0].mxu0 }
 0x24b   :  { %v291_v3 = vadd.f32 %v2694_v2, %v2438_v1  ;;  %v285_v4 = vpop.f32.mrb[1].mxu0 }
 0x24c   :  { %v286_v5 = vadd.f32 %v2438_v1, %v285_v4 }
 0x24e   :  { %v2697_v6 = vpop.f32.mrb[2].mxu0  ;;  %2706 = vmatprep.mubr.msk.f32.mxu1 %vm118_vm0, %v286_v5  ;;  %v3614_v7 = vpack.i.bf16 %v291_v3, %v286_v5 }
 0x24f   :  { %v301_v8 = vadd.f32 %v2697_v6, %v2438_v1  ;;  %v295_v9 = vpop.f32.mrb[3].mxu0 }
 0x250   :  { %v296_v10 = vadd.f32 %v2438_v1, %v295_v9  ;;  %3125 = vrot.lane.b32.xlu0 %v3614_v7, %s3386_s10 }
 0x252   :  { %v3618_v11 = vpack.i.bf16 %v301_v8, %v296_v10 }
 0x254   :  { %3130 = vrot.lane.b32.xlu1 %v3618_v11, %s3386_s10 }
 0x2c2   :  { %v3126_v12 = vpop.permute.xlu0 %3125 }
 0x2c3   :  { %v3128_v13 = vunpack.i.h.bf16 %v3126_v12  ;;  %v3127_v14 = vunpack.i.l.bf16 %v3126_v12 }
 0x2c5   :  { %v2946_v16 = vpack.c.bf16 %v3128_v13, %v3127_v14 }
 0x2c6   :  { %v3131_v17 = vpop.permute.xlu1 %3130 }
 0x2c7   :  { %v3133_v18 = vunpack.i.h.bf16 %v3131_v17  ;;  %v3132_v19 = vunpack.i.l.bf16 %v3131_v17  ;;  %2948 = vmatprep.subr.msk.bf16.mxu1 %vm3624_vm1, %v2946_v16 }
 0x2c8   :  { %2951 = vmatpush3.bf16.xpose.msk.msra.mxu1 %vm3624_vm1, %v2946_v16  ;;  %v579_v16 = vld [vmem:[%s4153_s8 + $0x8] sm:$0xff] }
 0x2c9   :  { %v2952_v20 = vpack.c.bf16 %v3133_v18, %v3132_v19 }
 0x2cb   :  { %2954 = vmatprep.subr.msk.bf16.mxu1 %vm3624_vm1, %v2952_v20 }
 0x2d0   :  { %2957 = vmatpush3.bf16.xpose.msk.msra.mxu1 %vm3624_vm1, %v2952_v20  ;;  %v580_v20 = vld [vmem:[%s4153_s8 + $0x10] sm:$0xff] }
 0x2d7   :  { %2707 = vmatmul.mubr.msk.f32.vlgmr.msra.gmra.mrb[0].mxu1 %vm118_vm0, %v291_v3 }
 0x2d8   :  { %2709 = vmatprep.mubr.msk.f32.mxu1 %vm118_vm0, %v296_v10 }
 0x2db   :  { %2710 = vmatmul.mubr.msk.f32.gmra.mrb[2].mxu1 %vm118_vm0, %v301_v8 }
 0x3aa   :  { %v2708_v21 = vpop.f32.mrb[0].mxu1 }
 0x3ab   :  { %v418_v23 = vmul.f32 0.17677669, %v2708_v21  ;;  %v398_v24 = vpop.f32.mrb[1].mxu1  ;;  %v581_v21 = vld [vmem:[%s4153_s8 + $0x18] sm:$0xff] }
 0x3ac   :  { %v417_v26 = vmul.f32 0.17677669, %v398_v24 }
 0x3ad   :  { %v422_v27 = vadd.f32 %v418_v23, %v3642_v22 }
 0x3ae   :  { %v2711_v28 = vpop.f32.mrb[2].mxu1  ;;  %v421_v29 = vadd.f32 %v417_v26, %v3647_v25  ;;  %v2970_v26 = vpack.c.bf16 %v581_v21, %v580_v20 }
 0x3af   :  { %v420_v31 = vmul.f32 0.17677669, %v2711_v28  ;;  %v408_v32 = vpop.f32.mrb[3].mxu1  ;;  %v428_v33 = vsel %vm118_vm0, %v422_v27, -inf }
 0x3b0   :  { %v419_v35 = vmul.f32 0.17677669, %v408_v32  ;;  %429 = vmax.xlane.f32.xlu0 %v428_v33  ;;  %v425_v36 = vsel %vm118_vm0, %v421_v29, -inf }
 0x3b1   :  { %426 = vmax.xlane.f32.xlu1 %v425_v36  ;;  %v424_v37 = vadd.f32 %v420_v31, %v3654_v30  ;;  %v2455_v36 = vld [vmem:[%s4154_s28] ss:$0 sm:$0xff] }
 0x3b2   :  { %v423_v38 = vadd.f32 %v419_v35, %v3660_v34 }
 0x3b3   :  { %v434_v39 = vsel %vm118_vm0, %v424_v37, -inf }
 0x3b4   :  { %v431_v40 = vsel %vm118_vm0, %v423_v38, -inf }
 0x3b5   :  { %435 = vmax.xlane.f32.xlu1 %v434_v39  ;;  %432 = vmax.xlane.f32.xlu0 %v431_v40 }
 0x43d   :  { %v430_v41 = vpop.xlane.xlu0 %429 }
 0x43e   :  { %v438_v42 = vsub.f32 %v422_v27, %v430_v41  ;;  %v427_v43 = vpop.xlane.xlu1 %426 }
 0x43f   :  { %v437_v44 = vsub.f32 %v421_v29, %v427_v43 }
 0x440   :  { %v443_v45 = vmul.f32 1.442695, %v438_v42 }
 0x441   :  { %v441_v46 = vmul.f32 1.442695, %v437_v44 }
 0x442   :  { %3172 = vpow2.f32 %v443_v45  ;;  %v436_v47 = vpop.xlane.xlu1 %435  ;;  %v433_v48 = vpop.xlane.xlu0 %432 }
 0x443   :  { %3174 = vpow2.f32 %v441_v46  ;;  %v440_v49 = vsub.f32 %v424_v37, %v436_v47  ;;  %v439_v50 = vsub.f32 %v423_v38, %v433_v48 }
 0x445   :  { %v447_v51 = vmul.f32 1.442695, %v440_v49  ;;  %v445_v52 = vmul.f32 1.442695, %v439_v50 }
 0x447   :  { %3176 = vpow2.f32 %v447_v51 }
 0x448   :  { %3178 = vpow2.f32 %v445_v52 }
 0x44c   :  { %v3173_v53 = vpop.eup %3172 }
 0x44d   :  { %v3175_v55 = vpop.eup %3174  ;;  %v452_v56 = vsel %vm118_vm0, %v3173_v53, 0.0 }
 0x44e   :  { %453 = vadd.xlane.f32.xlu1 %v452_v56  ;;  %v449_v57 = vsel %vm118_vm0, %v3175_v55, 0.0 }
 0x44f   :  { %450 = vadd.xlane.f32.xlu0 %v449_v57 }
 0x451   :  { %v3177_v58 = vpop.eup %3176 }
 0x452   :  { %v3179_v59 = vpop.eup %3178  ;;  %v458_v61 = vsel %vm118_vm0, %v3177_v58, 0.0 }
 0x453   :  { %459 = vadd.xlane.f32.xlu1 %v458_v61  ;;  %v455_v63 = vsel %vm118_vm0, %v3179_v59, 0.0 }
 0x454   :  { %456 = vadd.xlane.f32.xlu0 %v455_v63 }
 0x464   :  { %3140 = vrot.lane.b32.xlu1 %v3618_v11, %s3387_s1 }
 0x46a   :  { %3135 = vrot.lane.b32.xlu0 %v3614_v7, %s3387_s1  ;;  %v578_v7 = vld [vmem:[%s4153_s8] sm:$0xff] }
 0x46b   :  { %v2966_v18 = vpack.c.bf16 %v579_v16, %v578_v7 }
 0x4db   :  { %v454_v1 = vpop.xlane.xlu1 %453 }
 0x4dc   :  { %v451_v2 = vpop.xlane.xlu0 %450 }
 0x4dd   :  { %3180 = vrcp.f32 %v451_v2 }
 0x4de   :  { %3182 = vrcp.f32 %v454_v1 }
 0x4e0   :  { %v460_v3 = vpop.xlane.xlu1 %459 }
 0x4e1   :  { %v457_v4 = vpop.xlane.xlu0 %456 }
 0x4e2   :  { %3184 = vrcp.f32 %v457_v4 }
 0x4e3   :  { %3186 = vrcp.f32 %v460_v3 }
 0x4e4   :  { %v3141_v5 = vpop.permute.xlu1 %3140 }
 0x4e5   :  { %v3136_v6 = vpop.permute.xlu0 %3135  ;;  %v3143_v8 = vunpack.i.h.bf16 %v3141_v5  ;;  %v3142_v9 = vunpack.i.l.bf16 %v3141_v5 }
 0x4e6   :  { %v3138_v10 = vunpack.i.h.bf16 %v3136_v6  ;;  %v3137_v12 = vunpack.i.l.bf16 %v3136_v6 }
 0x4e7   :  { %v3181_v13 = vpop.eup %3180  ;;  %v2962_v17 = vpack.c.bf16 %v3143_v8, %v3142_v9 }
 0x4e8   :  { %v2958_v14 = vpack.c.bf16 %v3138_v10, %v3137_v12  ;;  %v465_v11 = vmul.f32 %v3181_v13, %v3175_v55  ;;  %v3183_v19 = vpop.eup %3182  ;;  %v764_v10 = vld [vmem:[%s4110_s11] sm:$0xff]  ;;  %v765_v12 = vld [vmem:[%s4110_s11 + $0x8] sm:$0xff] }
 0x4e9   :  { %v466_v24 = vmul.f32 %v3183_v19, %v3173_v53  ;;  %v2974_v13 = vpack.c.bf16 %v765_v12, %v764_v10  ;;  %v2462_v12 = vld [vmem:[%s4111_s12] ss:$0 sm:$0xff] }
 0x4ea   :  { %2959 = vmatprep.subr.bf16.mxu0 %v2958_v14  ;;  %2720 = vmatprep.mubr.msk.f32.mxu0 %vm118_vm0, %v465_v11  ;;  %v767_v11 = vld [vmem:[%s4110_s11 + $0x18] sm:$0xff] }
 0x4eb   :  { %2961 = vmatpush3.bf16.msra.mxu0 %v2958_v14  ;;  %v766_v14 = vld [vmem:[%s4110_s11 + $0x10] sm:$0xff]  ;;  %2975 = vmatprep.subr.bf16.mxu1 %v2974_v13 }
 0x4ec   :  { %2963 = vmatprep.subr.bf16.mxu0 %v2962_v17  ;;  %v3185_v23 = vpop.eup %3184  ;;  %v2978_v7 = vpack.c.bf16 %v767_v11, %v766_v14  ;;  %2977 = vmatpush3.bf16.msra.mxu1 %v2974_v13 }
 0x4ed   :  { %v3187_v27 = vpop.eup %3186  ;;  %v467_v28 = vmul.f32 %v3185_v23, %v3179_v59 }
 0x4ee   :  { %v468_v29 = vmul.f32 %v3187_v27, %v3177_v58  ;;  %2979 = vmatprep.subr.bf16.mxu1 %v2978_v7 }
 0x4ef   :  { %2965 = vmatpush3.bf16.msra.mxu0 %v2962_v17 }
 0x4f0   :  { %2967 = vmatprep.subr.bf16.mxu0 %v2966_v18  ;;  %2981 = vmatpush3.bf16.msra.mxu1 %v2978_v7 }
 0x4f2   :  { %2721 = vmatmul.mubr.msk.f32.vlgmr.msra.gmra.mrb[4].mxu0 %vm118_vm0, %v466_v24 }
 0x4f3   :  { %2723 = vmatprep.mubr.msk.f32.mxu0 %vm118_vm0, %v467_v28  ;;  %2969 = vmatpush3.bf16.msra.mxu0 %v2966_v18 }
 0x4f4   :  { %2971 = vmatprep.subr.bf16.mxu0 %v2970_v26 }
 0x4f6   :  { %2724 = vmatmul.mubr.msk.f32.gmra.mrb[6].mxu0 %vm118_vm0, %v468_v29 }
 0x4f7   :  { %2973 = vmatpush3.bf16.msra.mxu0 %v2970_v26 }
 0x5c5   :  { %v2722_v31 = vpop.f32.mrb[4].mxu0 }
 0x5c6   :  { %v559_v32 = vpop.f32.mrb[5].mxu0 }
 0x5c7   :  { %2734 = vmatprep.mubr.msk.f32.mxu0 %vm118_vm0, %v559_v32  ;;  %v2460_v32 = vld [vmem:[%s4155_s2] ss:$0 sm:$0xff] }
 0x5c8   :  { %2735 = vmatmul.mubr.msk.f32.vlgmr.msra.gmra.mrb[8].mxu0 %vm118_vm0, %v2722_v31 }
 0x5c9   :  { %v2725_v33 = vpop.f32.mrb[6].mxu0 }
 0x5ca   :  { %v569_v35 = vpop.f32.mrb[7].mxu0 }
 0x5cb   :  { %2737 = vmatprep.mubr.msk.f32.mxu0 %vm118_vm0, %v569_v35 }
 0x5cc   :  { %2738 = vmatmul.mubr.msk.f32.gmra.mrb[10].mxu0 %vm118_vm0, %v2725_v33 }
 0x69b   :  { %v2736_v37 = vpop.f32.mrb[8].mxu0 }
 0x69c   :  { %v673_v38 = vadd.f32 %v2736_v37, %v2455_v36  ;;  %v667_v39 = vpop.f32.mrb[9].mxu0  ;;  %v2461_v37 = vld [vmem:[%s4156_s6] ss:$0 sm:$0xff] }
 0x69d   :  { %v668_v40 = vadd.f32 %v2455_v36, %v667_v39 }
 0x69e   :  { %v687_v41 = vadd.f32 %v673_v38, %v3598_v60 }
 0x69f   :  { %v2739_v42 = vpop.f32.mrb[10].mxu0  ;;  %v686_v43 = vadd.f32 %v668_v40, %v3594_v54 }
 0x6a0   :  { %v683_v44 = vadd.f32 %v2739_v42, %v2455_v36  ;;  %v677_v45 = vpop.f32.mrb[11].mxu0  ;;  %v695_v46 = vsel %vm118_vm0, %v687_v41, 0.0 }
 0x6a1   :  { %v678_v47 = vadd.f32 %v2455_v36, %v677_v45  ;;  %696 = vadd.xlane.f32.xlu0 %v695_v46  ;;  %v692_v48 = vsel %vm118_vm0, %v686_v43, 0.0 }
 0x6a2   :  { %693 = vadd.xlane.f32.xlu1 %v692_v48  ;;  %v689_v49 = vadd.f32 %v683_v44, %v3606_v0 }
 0x6a3   :  { %v688_v50 = vadd.f32 %v678_v47, %v3600_v62 }
 0x6a4   :  { %v701_v51 = vsel %vm118_vm0, %v689_v49, 0.0 }
 0x6a5   :  { %v698_v60 = vsel %vm118_vm0, %v688_v50, 0.0 }
 0x6a6   :  { %699 = vadd.xlane.f32.xlu0 %v698_v60  ;;  %702 = vadd.xlane.f32.xlu1 %v701_v51  ;;  %v909_v51 = vld [vmem:[%s4112_s13 + $0x8] sm:$0xff] }
 0x72e   :  { %v697_v54 = vpop.xlane.xlu0 %696 }
 0x72f   :  { %v705_v52 = vmul.f32 0.03125, %v697_v54  ;;  %v694_v53 = vpop.xlane.xlu1 %693  ;;  %v910_v54 = vld [vmem:[%s4112_s13 + $0x10] sm:$0xff] }
 0x730   :  { %v704_v55 = vmul.f32 0.03125, %v694_v53 }
 0x731   :  { %v709_v56 = vsub.f32 %v687_v41, %v705_v52  ;;  %v911_v52 = vld [vmem:[%s4112_s13 + $0x18] sm:$0xff] }
 0x732   :  { %v708_v57 = vsub.f32 %v686_v43, %v704_v55  ;;  %v2986_v53 = vpack.c.bf16 %v911_v52, %v910_v54  ;;  %v912_v55 = vld [vmem:[%s4112_s13 + $0x20] sm:$0xff] }
 0x733   :  { %v700_v58 = vpop.xlane.xlu0 %699  ;;  %v703_v59 = vpop.xlane.xlu1 %702  ;;  %v713_v61 = vmul.f32 %v709_v56, %v709_v56 }
 0x734   :  { %v706_v63 = vmul.f32 0.03125, %v700_v58  ;;  %v707_v1 = vmul.f32 0.03125, %v703_v59  ;;  %v712_v0 = vmul.f32 %v708_v57, %v708_v57  ;;  %v914_v58 = vld [vmem:[%s4112_s13 + $0x30] sm:$0xff]  ;;  %v915_v59 = vld [vmem:[%s4112_s13 + $0x38] sm:$0xff] }
 0x735   :  { %v719_v62 = vsel %vm118_vm0, %v713_v61, 0.0  ;;  %v2994_v61 = vpack.c.bf16 %v915_v59, %v914_v58 }
 0x736   :  { %v710_v2 = vsub.f32 %v688_v50, %v706_v63  ;;  %v711_v3 = vsub.f32 %v689_v49, %v707_v1  ;;  %720 = vadd.xlane.f32.xlu1 %v719_v62  ;;  %v716_v4 = vsel %vm118_vm0, %v712_v0, 0.0  ;;  %v908_v50 = vld [vmem:[%s4112_s13] sm:$0xff]  ;;  %v917_v1 = vld [vmem:[%s4112_s13 + $0x48] sm:$0xff]  ;;  %v918_v62 = vld [vmem:[%s4112_s13 + $0x50] sm:$0xff] }
 0x737   :  { %717 = vadd.xlane.f32.xlu0 %v716_v4  ;;  %v2982_v60 = vpack.c.bf16 %v909_v51, %v908_v50  ;;  %v916_v63 = vld [vmem:[%s4112_s13 + $0x40] sm:$0xff] }
 0x738   :  { %v714_v5 = vmul.f32 %v710_v2, %v710_v2  ;;  %v715_v6 = vmul.f32 %v711_v3, %v711_v3  ;;  %v2998_v0 = vpack.c.bf16 %v917_v1, %v916_v63  ;;  %v920_v4 = vld [vmem:[%s4112_s13 + $0x60] sm:$0xff] }
 0x739   :  { %2983 = vmatprep.subr.bf16.mxu0 %v2982_v60 }
 0x73a   :  { %v722_v8 = vsel %vm118_vm0, %v714_v5, 0.0  ;;  %v725_v9 = vsel %vm118_vm0, %v715_v6, 0.0  ;;  %2985 = vmatpush3.bf16.msra.mxu0 %v2982_v60  ;;  %v921_v5 = vld [vmem:[%s4112_s13 + $0x68] sm:$0xff] }
 0x73b   :  { %723 = vadd.xlane.f32.xlu0 %v722_v8  ;;  %726 = vadd.xlane.f32.xlu1 %v725_v9  ;;  %v3006_v6 = vpack.c.bf16 %v921_v5, %v920_v4  ;;  %v922_v8 = vld [vmem:[%s4112_s13 + $0x70] sm:$0xff]  ;;  %v923_v9 = vld [vmem:[%s4112_s13 + $0x78] sm:$0xff] }
 0x73c   :  { %2987 = vmatprep.subr.bf16.mxu0 %v2986_v53  ;;  %v3010_v10 = vpack.c.bf16 %v923_v9, %v922_v8 }
 0x73e   :  { %2989 = vmatpush3.bf16.msra.mxu0 %v2986_v53 }
 0x7c3   :  { %v721_v16 = vpop.xlane.xlu1 %720 }
 0x7c4   :  { %v729_v17 = vmul.f32 0.03125, %v721_v16  ;;  %v718_v18 = vpop.xlane.xlu0 %717 }
 0x7c5   :  { %v728_v19 = vmul.f32 0.03125, %v718_v18 }
 0x7c6   :  { %v733_v20 = vadd.f32 1e-12, %v729_v17 }
 0x7c7   :  { %v732_v21 = vadd.f32 1e-12, %v728_v19 }
 0x7c8   :  { %3188 = vrsqrt.f32 %v733_v20  ;;  %v724_v23 = vpop.xlane.xlu0 %723  ;;  %v727_v24 = vpop.xlane.xlu1 %726 }
 0x7c9   :  { %3190 = vrsqrt.f32 %v732_v21  ;;  %v730_v26 = vmul.f32 0.03125, %v724_v23  ;;  %v731_v27 = vmul.f32 0.03125, %v727_v24 }
 0x7cb   :  { %v734_v28 = vadd.f32 1e-12, %v730_v26  ;;  %v735_v29 = vadd.f32 1e-12, %v731_v27 }
 0x7cd   :  { %3192 = vrsqrt.f32 %v734_v28 }
 0x7ce   :  { %3194 = vrsqrt.f32 %v735_v29 }
 0x7d2   :  { %v3189_v31 = vpop.eup %3188 }
 0x7d3   :  { %v3191_v33 = vpop.eup %3190  ;;  %v741_v35 = vmul.f32 %v3189_v31, %v709_v56  ;;  %v913_v56 = vld [vmem:[%s4112_s13 + $0x28] sm:$0xff] }
 0x7d4   :  { %v740_v36 = vmul.f32 %v3191_v33, %v708_v57  ;;  %v2990_v57 = vpack.c.bf16 %v913_v56, %v912_v55 }
 0x7d5   :  { %v751_v38 = vmul.f32 %v2460_v32, %v741_v35 }
 0x7d6   :  { %v750_v39 = vmul.f32 %v2460_v32, %v740_v36  ;;  %2991 = vmatprep.subr.bf16.mxu0 %v2990_v57 }
 0x7d7   :  { %v3193_v40 = vpop.eup %3192  ;;  %v3730_v44 = vadd.f32 %v2461_v37, %v751_v38  ;;  %2993 = vmatpush3.bf16.msra.mxu0 %v2990_v57 }
 0x7d8   :  { %v3195_v41 = vpop.eup %3194  ;;  %v3728_v42 = vadd.f32 %v2461_v37, %v750_v39  ;;  %v742_v43 = vmul.f32 %v3193_v40, %v710_v2  ;;  %2995 = vmatprep.subr.bf16.mxu0 %v2994_v61  ;;  %v919_v2 = vld [vmem:[%s4112_s13 + $0x58] sm:$0xff] }
 0x7d9   :  { %v743_v45 = vmul.f32 %v3195_v41, %v711_v3  ;;  %v3002_v3 = vpack.c.bf16 %v919_v2, %v918_v62 }
 0x7da   :  { %2748 = vmatprep.mubr.msk.f32.mxu1 %vm118_vm0, %v3728_v42  ;;  %v752_v46 = vmul.f32 %v2460_v32, %v742_v43 }
 0x7db   :  { %2749 = vmatmul.mubr.msk.f32.vlgmr.msra.gmra.mrb[4].mxu1 %vm118_vm0, %v3730_v44  ;;  %v753_v47 = vmul.f32 %v2460_v32, %v743_v45  ;;  %2997 = vmatpush3.bf16.msra.mxu0 %v2994_v61 }
 0x7dc   :  { %v3736_v48 = vadd.f32 %v2461_v37, %v752_v46  ;;  %2999 = vmatprep.subr.bf16.mxu0 %v2998_v0 }
 0x7dd   :  { %v3738_v49 = vadd.f32 %v2461_v37, %v753_v47 }
 0x7de   :  { %2751 = vmatprep.mubr.msk.f32.mxu1 %vm118_vm0, %v3736_v48 }
 0x7df   :  { %2752 = vmatmul.mubr.msk.f32.gmra.mrb[6].mxu1 %vm118_vm0, %v3738_v49  ;;  %3001 = vmatpush3.bf16.msra.mxu0 %v2998_v0  ;;  %v2467_v0 = vld [vmem:[%s4113_s14] ss:$0 sm:$0xff] }
 0x7e0   :  { %3003 = vmatprep.subr.bf16.mxu0 %v3002_v3 }
 0x7e3   :  { %3005 = vmatpush3.bf16.msra.mxu0 %v3002_v3 }
 0x7e4   :  { %3007 = vmatprep.subr.bf16.mxu0 %v3006_v6 }
 0x7e7   :  { %3009 = vmatpush3.bf16.msra.mxu0 %v3006_v6 }
 0x7e8   :  { %3011 = vmatprep.subr.bf16.mxu0 %v3010_v10 }
 0x7eb   :  { %3013 = vmatpush3.bf16.msra.mxu0 %v3010_v10 }
 0x8ae   :  { %v2750_v13 = vpop.f32.mrb[4].mxu1 }
 0x8af   :  { %v859_v14 = vadd.f32 %v2750_v13, %v2462_v12  ;;  %v853_v11 = vpop.f32.mrb[5].mxu1 }
 0x8b0   :  { %v854_v7 = vadd.f32 %v2462_v12, %v853_v11 }
 0x8b1   :  { %v873_v16 = vmul.f32 %v859_v14, %v859_v14 }
 0x8b2   :  { %v872_v17 = vmul.f32 %v854_v7, %v854_v7  ;;  %v2753_v18 = vpop.f32.mrb[6].mxu1 }
 0x8b3   :  { %v877_v19 = vmul.f32 %v873_v16, %v859_v14  ;;  %v869_v20 = vadd.f32 %v2753_v18, %v2462_v12  ;;  %v863_v21 = vpop.f32.mrb[7].mxu1 }
 0x8b4   :  { %v876_v23 = vmul.f32 %v872_v17, %v854_v7  ;;  %v864_v24 = vadd.f32 %v2462_v12, %v863_v21 }
 0x8b5   :  { %v881_v26 = vmul.f32 0.044715, %v877_v19  ;;  %v875_v27 = vmul.f32 %v869_v20, %v869_v20 }
 0x8b6   :  { %v880_v28 = vmul.f32 0.044715, %v876_v23  ;;  %v874_v29 = vmul.f32 %v864_v24, %v864_v24 }
 0x8b7   :  { %v885_v31 = vadd.f32 %v881_v26, %v859_v14  ;;  %v879_v32 = vmul.f32 %v875_v27, %v869_v20 }
 0x8b8   :  { %v884_v33 = vadd.f32 %v880_v28, %v854_v7  ;;  %v878_v35 = vmul.f32 %v874_v29, %v864_v24 }
 0x8b9   :  { %v889_v36 = vmul.f32 0.7978846, %v885_v31  ;;  %v883_v37 = vmul.f32 0.044715, %v879_v32 }
 0x8ba   :  { %v888_v38 = vmul.f32 0.7978846, %v884_v33  ;;  %v882_v39 = vmul.f32 0.044715, %v878_v35 }
 0x8bb   :  { %3196 = vtanh.f32 %v889_v36  ;;  %v887_v40 = vadd.f32 %v883_v37, %v869_v20 }
 0x8bc   :  { %v886_v41 = vadd.f32 %v882_v39, %v864_v24  ;;  %3198 = vtanh.f32 %v888_v38  ;;  %v2470_v38 = vld [vmem:[%s4146_s29 + $0x20] sm:$0xff]  ;;  %v2471_v39 = vld [vmem:[%s4146_s29 + $0x28] sm:$0xff] }
 0x8bd   :  { %v891_v43 = vmul.f32 0.7978846, %v887_v40  ;;  %v3014_v40 = vpack.c.bf16 %v2471_v39, %v2470_v38 }
 0x8be   :  { %v890_v45 = vmul.f32 0.7978846, %v886_v41  ;;  %v2472_v41 = vld [vmem:[%s4146_s29 + $0x30] sm:$0xff] }
 0x8bf   :  { %3200 = vtanh.f32 %v891_v43  ;;  %v2473_v43 = vld [vmem:[%s4146_s29 + $0x38] sm:$0xff]  ;;  %3015 = vmatprep.subr.bf16.mxu1 %v3014_v40 }
 0x8c0   :  { %3202 = vtanh.f32 %v890_v45  ;;  %v3018_v45 = vpack.c.bf16 %v2473_v43, %v2472_v41  ;;  %3017 = vmatpush3.bf16.msra.mxu1 %v3014_v40 }
 0x8c2   :  { %3019 = vmatprep.subr.bf16.mxu1 %v3018_v45 }
 0x8c4   :  { %3021 = vmatpush3.bf16.msra.mxu1 %v3018_v45 }
 0x8c5   :  { %v3197_v46 = vpop.eup %3196 }
 0x8c6   :  { %v3199_v47 = vpop.eup %3198  ;;  %v897_v50 = vadd.f32 1.0, %v3197_v46 }
 0x8c7   :  { %v896_v51 = vadd.f32 1.0, %v3199_v47 }
 0x8c8   :  { %v901_v60 = vmul.f32 0.5, %v897_v50 }
 0x8c9   :  { %v3201_v54 = vpop.eup %3200  ;;  %v900_v52 = vmul.f32 0.5, %v896_v51 }
 0x8ca   :  { %v3203_v53 = vpop.eup %3202  ;;  %v899_v55 = vadd.f32 1.0, %v3201_v54  ;;  %v905_v58 = vmul.f32 %v901_v60, %v859_v14 }
 0x8cb   :  { %v904_v56 = vmul.f32 %v900_v52, %v854_v7  ;;  %v898_v57 = vadd.f32 1.0, %v3203_v53 }
 0x8cc   :  { %v903_v59 = vmul.f32 0.5, %v899_v55 }
 0x8cd   :  { %2786 = vmatprep.mubr.f32.mxu0 %v904_v56  ;;  %v902_v61 = vmul.f32 0.5, %v898_v57 }
 0x8ce   :  { %2787 = vmatmul.mubr.f32.vlgmr.msra.gmra.mrb[12].mxu0 %v905_v58  ;;  %v907_v1 = vmul.f32 %v903_v59, %v869_v20 }
 0x8cf   :  { %v906_v63 = vmul.f32 %v902_v61, %v864_v24  ;;  %v2468_v61 = vld [vmem:[%s4114_s15] ss:$0 sm:$0xff] }
 0x8d1   :  { %2789 = vmatprep.mubr.f32.mxu0 %v906_v63 }
 0x8d2   :  { %2790 = vmatmul.mubr.f32.gmra.mrb[14].mxu0 %v907_v1 }
 0x9a1   :  { %v2788_v62 = vpop.f32.mrb[12].mxu0 }
 0x9a2   :  { %v1003_v2 = vadd.f32 %v2788_v62, %v2467_v0  ;;  %v997_v3 = vpop.f32.mrb[13].mxu0  ;;  %v2469_v62 = vld [vmem:[%s4115_s16] ss:$0 sm:$0xff] }
 0x9a3   :  { %v998_v4 = vadd.f32 %v2467_v0, %v997_v3 }
 0x9a4   :  { %v1017_v5 = vadd.f32 %v1003_v2, %v3730_v44 }
 0x9a5   :  { %v2791_v6 = vpop.f32.mrb[14].mxu0  ;;  %v1016_v8 = vadd.f32 %v998_v4, %v3728_v42 }
 0x9a6   :  { %v1013_v9 = vadd.f32 %v2791_v6, %v2467_v0  ;;  %v1007_v10 = vpop.f32.mrb[15].mxu0  ;;  %v1025_v12 = vsel %vm118_vm0, %v1017_v5, 0.0 }
 0x9a7   :  { %v1008_v13 = vadd.f32 %v2467_v0, %v1007_v10  ;;  %1026 = vadd.xlane.f32.xlu1 %v1025_v12  ;;  %v1022_v14 = vsel %vm118_vm0, %v1016_v8, 0.0 }
 0x9a8   :  { %1023 = vadd.xlane.f32.xlu0 %v1022_v14  ;;  %v1019_v11 = vadd.f32 %v1013_v9, %v3738_v49 }
 0x9a9   :  { %v1018_v7 = vadd.f32 %v1008_v13, %v3736_v48 }
 0x9aa   :  { %v1031_v16 = vsel %vm118_vm0, %v1019_v11, 0.0 }
 0x9ab   :  { %1032 = vadd.xlane.f32.xlu1 %v1031_v16  ;;  %v1028_v44 = vsel %vm118_vm0, %v1018_v7, 0.0 }
 0x9ac   :  { %1029 = vadd.xlane.f32.xlu0 %v1028_v44 }
 0xa34   :  { %v1027_v42 = vpop.xlane.xlu1 %1026 }
 0xa35   :  { %v1035_v17 = vmul.f32 0.03125, %v1027_v42  ;;  %v1024_v18 = vpop.xlane.xlu0 %1023 }
 0xa36   :  { %v1034_v19 = vmul.f32 0.03125, %v1024_v18 }
 0xa37   :  { %v1039_v20 = vsub.f32 %v1017_v5, %v1035_v17 }
 0xa38   :  { %v1038_v21 = vsub.f32 %v1016_v8, %v1034_v19  ;;  %v1033_v23 = vpop.xlane.xlu1 %1032 }
 0xa39   :  { %v1037_v24 = vmul.f32 0.03125, %v1033_v23  ;;  %v1030_v26 = vpop.xlane.xlu0 %1029  ;;  %v1043_v27 = vmul.f32 %v1039_v20, %v1039_v20 }
 0xa3a   :  { %v1036_v28 = vmul.f32 0.03125, %v1030_v26  ;;  %v1042_v49 = vmul.f32 %v1038_v21, %v1038_v21 }
 0xa3b   :  { %v1041_v29 = vsub.f32 %v1019_v11, %v1037_v24  ;;  %v1049_v48 = vsel %vm118_vm0, %v1043_v27, 0.0 }
 0xa3c   :  { %v1040_v31 = vsub.f32 %v1018_v7, %v1036_v28  ;;  %1050 = vadd.xlane.f32.xlu1 %v1049_v48  ;;  %v1046_v32 = vsel %vm118_vm0, %v1042_v49, 0.0  ;;  %v2475_v7 = vld [vmem:[%s4149_s5 + $0x1] ss:$0 sm:$0xff] }
 0xa3d   :  { %1047 = vadd.xlane.f32.xlu0 %v1046_v32  ;;  %v1045_v33 = vmul.f32 %v1041_v29, %v1041_v29 }
 0xa3e   :  { %v1044_v35 = vmul.f32 %v1040_v31, %v1040_v31 }
 0xa3f   :  { %v1055_v36 = vsel %vm118_vm0, %v1045_v33, 0.0 }
 0xa40   :  { %1056 = vadd.xlane.f32.xlu1 %v1055_v36  ;;  %v1052_v37 = vsel %vm118_vm0, %v1044_v35, 0.0 }
 0xa41   :  { %1053 = vadd.xlane.f32.xlu0 %v1052_v37 }
 0xac9   :  { %v1051_v46 = vpop.xlane.xlu1 %1050 }
 0xaca   :  { %v1059_v47 = vmul.f32 0.03125, %v1051_v46  ;;  %v1048_v50 = vpop.xlane.xlu0 %1047 }
 0xacb   :  { %v1058_v51 = vmul.f32 0.03125, %v1048_v50 }
 0xacc   :  { %v1063_v60 = vadd.f32 1e-12, %v1059_v47 }
 0xacd   :  { %v1062_v54 = vadd.f32 1e-12, %v1058_v51  ;;  %v1057_v52 = vpop.xlane.xlu1 %1056 }
 0xace   :  { %3204 = vrsqrt.f32 %v1063_v60  ;;  %v1061_v53 = vmul.f32 0.03125, %v1057_v52  ;;  %v1054_v55 = vpop.xlane.xlu0 %1053 }
 0xacf   :  { %3206 = vrsqrt.f32 %v1062_v54  ;;  %v1060_v56 = vmul.f32 0.03125, %v1054_v55 }
 0xad0   :  { %v1065_v57 = vadd.f32 1e-12, %v1061_v53 }
 0xad1   :  { %v1064_v58 = vadd.f32 1e-12, %v1060_v56 }
 0xad2   :  { %3208 = vrsqrt.f32 %v1065_v57 }
 0xad3   :  { %3210 = vrsqrt.f32 %v1064_v58 }
 0xad8   :  { %v3205_v59 = vpop.eup %3204 }
 0xad9   :  { %v3207_v63 = vpop.eup %3206  ;;  %v1071_v1 = vmul.f32 %v3205_v59, %v1039_v20 }
 0xada   :  { %v1070_v0 = vmul.f32 %v3207_v63, %v1038_v21 }
 0xadb   :  { %v1081_v2 = vmul.f32 %v2468_v61, %v1071_v1 }
 0xadc   :  { %v3209_v3 = vpop.eup %3208  ;;  %v1080_v4 = vmul.f32 %v2468_v61, %v1070_v0 }
 0xadd   :  { %v3211_v5 = vpop.eup %3210  ;;  %v1073_v6 = vmul.f32 %v3209_v3, %v1041_v29  ;;  %v3830_v10 = vadd.f32 %v2469_v62, %v1081_v2 }
 0xade   :  { %v3828_v8 = vadd.f32 %v2469_v62, %v1080_v4  ;;  %v1072_v9 = vmul.f32 %v3211_v5, %v1040_v31  ;;  %v2492_v5 = vld [vmem:[%s4153_s8 + $0x20] sm:$0xff] }
 0xadf   :  { %v1083_v12 = vmul.f32 %v2468_v61, %v1073_v6  ;;  %v2493_v6 = vld [vmem:[%s4153_s8 + $0x28] sm:$0xff] }
 0xae0   :  { %2800 = vmatprep.mubr.msk.f32.mxu1 %vm118_vm0, %v3828_v8  ;;  %v1082_v13 = vmul.f32 %v2468_v61, %v1072_v9  ;;  %v2494_v9 = vld [vmem:[%s4153_s8 + $0x30] sm:$0xff] }
 0xae1   :  { %2801 = vmatmul.mubr.msk.f32.vlgmr.msra.gmra.mrb[8].mxu1 %vm118_vm0, %v3830_v10  ;;  %v3838_v11 = vadd.f32 %v2469_v62, %v1083_v12  ;;  %v3042_v12 = vpack.c.bf16 %v2493_v6, %v2492_v5 }
 0xae2   :  { %v3836_v14 = vadd.f32 %v2469_v62, %v1082_v13  ;;  %v2495_v13 = vld [vmem:[%s4153_s8 + $0x38] sm:$0xff] }
 0xae3   :  { %3043 = vmatprep.subr.bf16.mxu0 %v3042_v12 }
 0xae4   :  { %2803 = vmatprep.mubr.msk.f32.mxu1 %vm118_vm0, %v3836_v14  ;;  %3045 = vmatpush3.bf16.msra.mxu0 %v3042_v12  ;;  %v2506_v12 = vld [vmem:[%s4110_s11 + $0x20] sm:$0xff] }
 0xae5   :  { %2804 = vmatmul.mubr.msk.f32.gmra.mrb[10].mxu1 %vm118_vm0, %v3838_v11 }
 0xbb4   :  { %v2802_v16 = vpop.f32.mrb[8].mxu1 }
 0xbb5   :  { %v1191_v44 = vadd.f32 %v2802_v16, %v2475_v7  ;;  %v1185_v42 = vpop.f32.mrb[9].mxu1 }
 0xbb6   :  { %v1186_v17 = vadd.f32 %v2475_v7, %v1185_v42 }
 0xbb8   :  { %v2805_v18 = vpop.f32.mrb[10].mxu1  ;;  %2814 = vmatprep.mubr.msk.f32.mxu1 %vm118_vm0, %v1186_v17  ;;  %v3848_v19 = vpack.i.bf16 %v1191_v44, %v1186_v17 }
 0xbb9   :  { %v1201_v20 = vadd.f32 %v2805_v18, %v2475_v7  ;;  %v1195_v21 = vpop.f32.mrb[11].mxu1 }
 0xbba   :  { %v1196_v23 = vadd.f32 %v2475_v7, %v1195_v21  ;;  %3145 = vrot.lane.b32.xlu0 %v3848_v19, %s3386_s10  ;;  %v3046_v7 = vpack.c.bf16 %v2495_v13, %v2494_v9  ;;  %v2507_v13 = vld [vmem:[%s4110_s11 + $0x28] sm:$0xff] }
 0xbbc   :  { %v3852_v24 = vpack.i.bf16 %v1201_v20, %v1196_v23  ;;  %3047 = vmatprep.subr.bf16.mxu0 %v3046_v7 }
 0xbbd   :  { %3049 = vmatpush3.bf16.msra.mxu0 %v3046_v7  ;;  %v3050_v7 = vpack.c.bf16 %v2507_v13, %v2506_v12 }
 0xbbe   :  { %3150 = vrot.lane.b32.xlu1 %v3852_v24, %s3386_s10 }
 0xc2c   :  { %v3146_v26 = vpop.permute.xlu0 %3145 }
 0xc2d   :  { %v3148_v27 = vunpack.i.h.bf16 %v3146_v26  ;;  %v3147_v28 = vunpack.i.l.bf16 %v3146_v26 }
 0xc2f   :  { %v3022_v49 = vpack.c.bf16 %v3148_v27, %v3147_v28 }
 0xc30   :  { %v3151_v29 = vpop.permute.xlu1 %3150 }
 0xc31   :  { %v3153_v48 = vunpack.i.h.bf16 %v3151_v29  ;;  %v3152_v31 = vunpack.i.l.bf16 %v3151_v29  ;;  %3024 = vmatprep.subr.msk.bf16.mxu1 %vm3624_vm1, %v3022_v49 }
 0xc32   :  { %3027 = vmatpush3.bf16.xpose.msk.msra.mxu1 %vm3624_vm1, %v3022_v49 }
 0xc33   :  { %v3028_v32 = vpack.c.bf16 %v3153_v48, %v3152_v31 }
 0xc35   :  { %3030 = vmatprep.subr.msk.bf16.mxu1 %vm3624_vm1, %v3028_v32 }
 0xc3a   :  { %3033 = vmatpush3.bf16.xpose.msk.msra.mxu1 %vm3624_vm1, %v3028_v32 }
 0xc41   :  { %2815 = vmatmul.mubr.msk.f32.vlgmr.msra.gmra.mrb[12].mxu1 %vm118_vm0, %v1191_v44 }
 0xc42   :  { %2817 = vmatprep.mubr.msk.f32.mxu1 %vm118_vm0, %v1196_v23 }
 0xc45   :  { %2818 = vmatmul.mubr.msk.f32.gmra.mrb[14].mxu1 %vm118_vm0, %v1201_v20 }
 0xd14   :  { %v2816_v33 = vpop.f32.mrb[12].mxu1 }
 0xd15   :  { %v1318_v35 = vmul.f32 0.17677669, %v2816_v33  ;;  %v1298_v36 = vpop.f32.mrb[13].mxu1 }
 0xd16   :  { %v1317_v37 = vmul.f32 0.17677669, %v1298_v36 }
 0xd17   :  { %v1322_v38 = vadd.f32 %v1318_v35, %v3642_v22 }
 0xd18   :  { %v2819_v39 = vpop.f32.mrb[14].mxu1  ;;  %v1321_v40 = vadd.f32 %v1317_v37, %v3647_v25 }
 0xd19   :  { %v1320_v41 = vmul.f32 0.17677669, %v2819_v39  ;;  %v1308_v43 = vpop.f32.mrb[15].mxu1  ;;  %v1328_v15 = vsel %vm118_vm0, %v1322_v38, -inf }
 0xd1a   :  { %v1319_v45 = vmul.f32 0.17677669, %v1308_v43  ;;  %1329 = vmax.xlane.f32.xlu0 %v1328_v15  ;;  %v1325_v46 = vsel %vm118_vm0, %v1321_v40, -inf }
 0xd1b   :  { %1326 = vmax.xlane.f32.xlu1 %v1325_v46  ;;  %v1324_v47 = vadd.f32 %v1320_v41, %v3654_v30 }
 0xd1c   :  { %v1323_v50 = vadd.f32 %v1319_v45, %v3660_v34 }
 0xd1d   :  { %v1334_v51 = vsel %vm118_vm0, %v1324_v47, -inf }
 0xd1e   :  { %v1331_v22 = vsel %vm118_vm0, %v1323_v50, -inf }
 0xd1f   :  { %1335 = vmax.xlane.f32.xlu1 %v1334_v51  ;;  %1332 = vmax.xlane.f32.xlu0 %v1331_v22 }
 0xda7   :  { %v1330_v25 = vpop.xlane.xlu0 %1329 }
 0xda8   :  { %v1338_v60 = vsub.f32 %v1322_v38, %v1330_v25  ;;  %v1327_v54 = vpop.xlane.xlu1 %1326 }
 0xda9   :  { %v1337_v52 = vsub.f32 %v1321_v40, %v1327_v54  ;;  %v2497_v40 = vld [vmem:[%s4154_s28 + $0x1] ss:$0 sm:$0xff] }
 0xdaa   :  { %v1343_v53 = vmul.f32 1.442695, %v1338_v60 }
 0xdab   :  { %v1341_v55 = vmul.f32 1.442695, %v1337_v52 }
 0xdac   :  { %3212 = vpow2.f32 %v1343_v53  ;;  %v1336_v56 = vpop.xlane.xlu1 %1335  ;;  %v1333_v57 = vpop.xlane.xlu0 %1332 }
 0xdad   :  { %3214 = vpow2.f32 %v1341_v55  ;;  %v1340_v58 = vsub.f32 %v1324_v47, %v1336_v56  ;;  %v1339_v30 = vsub.f32 %v1323_v50, %v1333_v57 }
 0xdaf   :  { %v1347_v59 = vmul.f32 1.442695, %v1340_v58  ;;  %v1345_v34 = vmul.f32 1.442695, %v1339_v30 }
 0xdb1   :  { %3216 = vpow2.f32 %v1347_v59 }
 0xdb2   :  { %3218 = vpow2.f32 %v1345_v34 }
 0xdb6   :  { %v3213_v61 = vpop.eup %3212 }
 0xdb7   :  { %v3215_v63 = vpop.eup %3214  ;;  %v1352_v1 = vsel %vm118_vm0, %v3213_v61, 0.0 }
 0xdb8   :  { %1353 = vadd.xlane.f32.xlu1 %v1352_v1  ;;  %v1349_v0 = vsel %vm118_vm0, %v3215_v63, 0.0 }
 0xdb9   :  { %1350 = vadd.xlane.f32.xlu0 %v1349_v0 }
 0xdbb   :  { %v3217_v62 = vpop.eup %3216 }
 0xdbc   :  { %v3219_v2 = vpop.eup %3218  ;;  %v1358_v3 = vsel %vm118_vm0, %v3217_v62, 0.0 }
 0xdbd   :  { %1359 = vadd.xlane.f32.xlu1 %v1358_v3  ;;  %v1355_v4 = vsel %vm118_vm0, %v3219_v2, 0.0 }
 0xdbe   :  { %1356 = vadd.xlane.f32.xlu0 %v1355_v4 }
 0xdce   :  { %3160 = vrot.lane.b32.xlu1 %v3852_v24, %s3387_s1 }
 0xdd4   :  { %3155 = vrot.lane.b32.xlu0 %v3848_v19, %s3387_s1 }
 0xe45   :  { %v1354_v16 = vpop.xlane.xlu1 %1353 }
 0xe46   :  { %v1351_v44 = vpop.xlane.xlu0 %1350 }
 0xe47   :  { %3220 = vrcp.f32 %v1351_v44  ;;  %v2509_v44 = vld [vmem:[%s4110_s11 + $0x38] sm:$0xff] }
 0xe48   :  { %3222 = vrcp.f32 %v1354_v16  ;;  %v2508_v16 = vld [vmem:[%s4110_s11 + $0x30] sm:$0xff] }
 0xe4a   :  { %v1360_v42 = vpop.xlane.xlu1 %1359 }
 0xe4b   :  { %v1357_v17 = vpop.xlane.xlu0 %1356 }
 0xe4c   :  { %3224 = vrcp.f32 %v1357_v17 }
 0xe4d   :  { %3226 = vrcp.f32 %v1360_v42  ;;  %v3054_v42 = vpack.c.bf16 %v2509_v44, %v2508_v16 }
 0xe4e   :  { %v3161_v18 = vpop.permute.xlu1 %3160 }
 0xe4f   :  { %v3156_v19 = vpop.permute.xlu0 %3155  ;;  %v3163_v20 = vunpack.i.h.bf16 %v3161_v18  ;;  %v3162_v21 = vunpack.i.l.bf16 %v3161_v18 }
 0xe50   :  { %v3158_v23 = vunpack.i.h.bf16 %v3156_v19  ;;  %v3157_v24 = vunpack.i.l.bf16 %v3156_v19 }
 0xe51   :  { %v3221_v26 = vpop.eup %3220  ;;  %v3038_v49 = vpack.c.bf16 %v3163_v20, %v3162_v21 }
 0xe52   :  { %v3034_v27 = vpack.c.bf16 %v3158_v23, %v3157_v24  ;;  %v1365_v28 = vmul.f32 %v3221_v26, %v3215_v63  ;;  %v3223_v29 = vpop.eup %3222 }
 0xe53   :  { %v1366_v31 = vmul.f32 %v3223_v29, %v3213_v61 }
 0xe54   :  { %3035 = vmatprep.subr.bf16.mxu1 %v3034_v27  ;;  %2828 = vmatprep.mubr.msk.f32.mxu1 %vm118_vm0, %v1365_v28 }
 0xe55   :  { %3037 = vmatpush3.bf16.msra.mxu1 %v3034_v27 }
 0xe56   :  { %3039 = vmatprep.subr.bf16.mxu1 %v3038_v49  ;;  %v3225_v48 = vpop.eup %3224 }
 0xe57   :  { %v3227_v32 = vpop.eup %3226  ;;  %v1367_v33 = vmul.f32 %v3225_v48, %v3219_v2 }
 0xe58   :  { %v1368_v35 = vmul.f32 %v3227_v32, %v3217_v62 }
 0xe59   :  { %3041 = vmatpush3.bf16.msra.mxu1 %v3038_v49 }
 0xe5a   :  { %3051 = vmatprep.subr.bf16.mxu1 %v3050_v7 }
 0xe5c   :  { %2829 = vmatmul.mubr.msk.f32.vlgmr.msra.gmra.mrb[16].mxu1 %vm118_vm0, %v1366_v31  ;;  %v2504_v31 = vld [vmem:[%s4155_s2 + $0x1] ss:$0 sm:$0xff] }
 0xe5d   :  { %2831 = vmatprep.mubr.msk.f32.mxu1 %vm118_vm0, %v1367_v33  ;;  %3053 = vmatpush3.bf16.msra.mxu1 %v3050_v7 }
 0xe5e   :  { %3055 = vmatprep.subr.bf16.mxu1 %v3054_v42 }
 0xe60   :  { %2832 = vmatmul.mubr.msk.f32.gmra.mrb[18].mxu1 %vm118_vm0, %v1368_v35 }
 0xe61   :  { %3057 = vmatpush3.bf16.msra.mxu1 %v3054_v42 }
 0xf2f   :  { %v2830_v36 = vpop.f32.mrb[16].mxu1 }
 0xf30   :  { %v1459_v37 = vpop.f32.mrb[17].mxu1 }
 0xf31   :  { %2842 = vmatprep.mubr.msk.f32.mxu0 %vm118_vm0, %v1459_v37 }
 0xf32   :  { %2843 = vmatmul.mubr.msk.f32.vlgmr.msra.gmra.mrb[16].mxu0 %vm118_vm0, %v2830_v36  ;;  %v2505_v36 = vld [vmem:[%s4156_s6 + $0x1] ss:$0 sm:$0xff] }
 0xf33   :  { %v2833_v38 = vpop.f32.mrb[18].mxu1 }
 0xf34   :  { %v1469_v39 = vpop.f32.mrb[19].mxu1 }
 0xf35   :  { %2845 = vmatprep.mubr.msk.f32.mxu0 %vm118_vm0, %v1469_v39 }
 0xf36   :  { %2846 = vmatmul.mubr.msk.f32.gmra.mrb[18].mxu0 %vm118_vm0, %v2833_v38 }
0x1005   :  { %v2844_v41 = vpop.f32.mrb[16].mxu0 }
0x1006   :  { %v1575_v43 = vadd.f32 %v2844_v41, %v2497_v40  ;;  %v1569_v15 = vpop.f32.mrb[17].mxu0 }
0x1007   :  { %v1570_v45 = vadd.f32 %v2497_v40, %v1569_v15 }
0x1008   :  { %v1589_v46 = vadd.f32 %v1575_v43, %v3830_v10 }
0x1009   :  { %v2847_v47 = vpop.f32.mrb[18].mxu0  ;;  %v1588_v50 = vadd.f32 %v1570_v45, %v3828_v8 }
0x100a   :  { %v1585_v51 = vadd.f32 %v2847_v47, %v2497_v40  ;;  %v1579_v22 = vpop.f32.mrb[19].mxu0  ;;  %v1599_v25 = vsel %vm118_vm0, %v1589_v46, 0.0 }
0x100b   :  { %v1580_v60 = vadd.f32 %v2497_v40, %v1579_v22  ;;  %1600 = vadd.xlane.f32.xlu0 %v1599_v25  ;;  %v1596_v54 = vsel %vm118_vm0, %v1588_v50, 0.0  ;;  %v2516_v22 = vld [vmem:[%s4112_s13 + $0x80] sm:$0xff]  ;;  %v2517_v25 = vld [vmem:[%s4112_s13 + $0x88] sm:$0xff] }
0x100c   :  { %1597 = vadd.xlane.f32.xlu1 %v1596_v54  ;;  %v1591_v52 = vadd.f32 %v1585_v51, %v3838_v11  ;;  %v2518_v54 = vld [vmem:[%s4112_s13 + $0x90] sm:$0xff] }
0x100d   :  { %v1590_v53 = vadd.f32 %v1580_v60, %v3836_v14  ;;  %v3058_v60 = vpack.c.bf16 %v2517_v25, %v2516_v22 }
0x100e   :  { %v1605_v55 = vsel %vm118_vm0, %v1591_v52, 0.0 }
0x100f   :  { %v1602_v10 = vsel %vm118_vm0, %v1590_v53, 0.0  ;;  %3059 = vmatprep.subr.bf16.mxu0 %v3058_v60 }
0x1010   :  { %1606 = vadd.xlane.f32.xlu1 %v1605_v55  ;;  %1603 = vadd.xlane.f32.xlu0 %v1602_v10  ;;  %v2520_v55 = vld [vmem:[%s4112_s13 + $0xa0] sm:$0xff]  ;;  %v2521_v10 = vld [vmem:[%s4112_s13 + $0xa8] sm:$0xff] }
0x1011   :  { %3061 = vmatpush3.bf16.msra.mxu0 %v3058_v60 }
0x1098   :  { %v1601_v8 = vpop.xlane.xlu0 %1600 }
0x1099   :  { %v1609_v56 = vmul.f32 0.03125, %v1601_v8  ;;  %v1598_v57 = vpop.xlane.xlu1 %1597  ;;  %v3066_v8 = vpack.c.bf16 %v2521_v10, %v2520_v55 }
0x109a   :  { %v1608_v58 = vmul.f32 0.03125, %v1598_v57  ;;  %v2523_v57 = vld [vmem:[%s4112_s13 + $0xb8] sm:$0xff] }
0x109b   :  { %v1613_v30 = vsub.f32 %v1589_v46, %v1609_v56  ;;  %v2522_v56 = vld [vmem:[%s4112_s13 + $0xb0] sm:$0xff] }
0x109c   :  { %v1612_v59 = vsub.f32 %v1588_v50, %v1608_v58  ;;  %v3070_v58 = vpack.c.bf16 %v2523_v57, %v2522_v56  ;;  %v2533_v56 = vld [vmem:[%s4113_s14 + $0x1] ss:$0 sm:$0xff] }
0x109d   :  { %v1607_v34 = vpop.xlane.xlu1 %1606  ;;  %v1604_v61 = vpop.xlane.xlu0 %1603  ;;  %v1617_v63 = vmul.f32 %v1613_v30, %v1613_v30 }
0x109e   :  { %v1611_v1 = vmul.f32 0.03125, %v1607_v34  ;;  %v1610_v0 = vmul.f32 0.03125, %v1604_v61  ;;  %v1616_v11 = vmul.f32 %v1612_v59, %v1612_v59  ;;  %v2526_v61 = vld [vmem:[%s4112_s13 + $0xd0] sm:$0xff] }
0x109f   :  { %v1623_v14 = vsel %vm118_vm0, %v1617_v63, 0.0  ;;  %v2527_v63 = vld [vmem:[%s4112_s13 + $0xd8] sm:$0xff] }
0x10a0   :  { %v1615_v62 = vsub.f32 %v1591_v52, %v1611_v1  ;;  %v1614_v2 = vsub.f32 %v1590_v53, %v1610_v0  ;;  %1624 = vadd.xlane.f32.xlu1 %v1623_v14  ;;  %v1620_v3 = vsel %vm118_vm0, %v1616_v11, 0.0  ;;  %v2519_v52 = vld [vmem:[%s4112_s13 + $0x98] sm:$0xff]  ;;  %v3078_v1 = vpack.c.bf16 %v2527_v63, %v2526_v61  ;;  %v2528_v0 = vld [vmem:[%s4112_s13 + $0xe0] sm:$0xff]  ;;  %v2529_v11 = vld [vmem:[%s4112_s13 + $0xe8] sm:$0xff] }
0x10a1   :  { %1621 = vadd.xlane.f32.xlu0 %v1620_v3  ;;  %v3062_v53 = vpack.c.bf16 %v2519_v52, %v2518_v54  ;;  %v3082_v14 = vpack.c.bf16 %v2529_v11, %v2528_v0 }
0x10a2   :  { %v1619_v4 = vmul.f32 %v1615_v62, %v1615_v62  ;;  %v1618_v5 = vmul.f32 %v1614_v2, %v1614_v2 }
0x10a3   :  { %3063 = vmatprep.subr.bf16.mxu0 %v3062_v53 }
0x10a4   :  { %v1629_v6 = vsel %vm118_vm0, %v1619_v4, 0.0  ;;  %v1626_v9 = vsel %vm118_vm0, %v1618_v5, 0.0  ;;  %3065 = vmatpush3.bf16.msra.mxu0 %v3062_v53  ;;  %v2511_v4 = vld [vmem:[%s4111_s12 + $0x1] ss:$0 sm:$0xff] }
0x10a5   :  { %1630 = vadd.xlane.f32.xlu1 %v1629_v6  ;;  %1627 = vadd.xlane.f32.xlu0 %v1626_v9 }
0x10a6   :  { %3067 = vmatprep.subr.bf16.mxu0 %v3066_v8 }
0x10a8   :  { %3069 = vmatpush3.bf16.msra.mxu0 %v3066_v8 }
0x10a9   :  { %3071 = vmatprep.subr.bf16.mxu0 %v3070_v58 }
0x10ac   :  { %3073 = vmatpush3.bf16.msra.mxu0 %v3070_v58 }
0x112d   :  { %v1625_v17 = vpop.xlane.xlu1 %1624 }
0x112e   :  { %v1633_v18 = vmul.f32 0.03125, %v1625_v17  ;;  %v1622_v19 = vpop.xlane.xlu0 %1621 }
0x112f   :  { %v1632_v20 = vmul.f32 0.03125, %v1622_v19 }
0x1130   :  { %v1637_v21 = vadd.f32 1e-12, %v1633_v18 }
0x1131   :  { %v1636_v23 = vadd.f32 1e-12, %v1632_v20 }
0x1132   :  { %3228 = vrsqrt.f32 %v1637_v21  ;;  %v1631_v24 = vpop.xlane.xlu1 %1630  ;;  %v1628_v26 = vpop.xlane.xlu0 %1627 }
0x1133   :  { %3230 = vrsqrt.f32 %v1636_v23  ;;  %v1635_v27 = vmul.f32 0.03125, %v1631_v24  ;;  %v1634_v28 = vmul.f32 0.03125, %v1628_v26 }
0x1135   :  { %v1639_v49 = vadd.f32 1e-12, %v1635_v27  ;;  %v1638_v29 = vadd.f32 1e-12, %v1634_v28 }
0x1137   :  { %3232 = vrsqrt.f32 %v1639_v49 }
0x1138   :  { %3234 = vrsqrt.f32 %v1638_v29 }
0x113c   :  { %v3229_v48 = vpop.eup %3228 }
0x113d   :  { %v3231_v32 = vpop.eup %3230  ;;  %v1645_v33 = vmul.f32 %v3229_v48, %v1613_v30  ;;  %v2524_v30 = vld [vmem:[%s4112_s13 + $0xc0] sm:$0xff] }
0x113e   :  { %v1644_v35 = vmul.f32 %v3231_v32, %v1612_v59  ;;  %v2525_v59 = vld [vmem:[%s4112_s13 + $0xc8] sm:$0xff] }
0x113f   :  { %v1655_v37 = vmul.f32 %v2504_v31, %v1645_v33  ;;  %v3074_v34 = vpack.c.bf16 %v2525_v59, %v2524_v30 }
0x1140   :  { %v1654_v38 = vmul.f32 %v2504_v31, %v1644_v35 }
0x1141   :  { %v3233_v39 = vpop.eup %3232  ;;  %v3938_v15 = vadd.f32 %v2505_v36, %v1655_v37  ;;  %3075 = vmatprep.subr.bf16.mxu0 %v3074_v34 }
0x1142   :  { %v3235_v40 = vpop.eup %3234  ;;  %v3936_v41 = vadd.f32 %v2505_v36, %v1654_v38  ;;  %v1647_v43 = vmul.f32 %v3233_v39, %v1615_v62  ;;  %3077 = vmatpush3.bf16.msra.mxu0 %v3074_v34  ;;  %v2530_v62 = vld [vmem:[%s4112_s13 + $0xf0] sm:$0xff] }
0x1143   :  { %v1646_v45 = vmul.f32 %v3235_v40, %v1614_v2  ;;  %3079 = vmatprep.subr.bf16.mxu0 %v3078_v1  ;;  %v2531_v2 = vld [vmem:[%s4112_s13 + $0xf8] sm:$0xff] }
0x1144   :  { %2856 = vmatprep.mubr.msk.f32.mxu1 %vm118_vm0, %v3936_v41  ;;  %v1657_v46 = vmul.f32 %v2504_v31, %v1647_v43  ;;  %v3086_v3 = vpack.c.bf16 %v2531_v2, %v2530_v62 }
0x1145   :  { %2857 = vmatmul.mubr.msk.f32.vlgmr.msra.gmra.mrb[20].mxu1 %vm118_vm0, %v3938_v15  ;;  %v1656_v47 = vmul.f32 %v2504_v31, %v1646_v45 }
0x1146   :  { %v3944_v50 = vadd.f32 %v2505_v36, %v1657_v46  ;;  %3081 = vmatpush3.bf16.msra.mxu0 %v3078_v1 }
0x1147   :  { %v3946_v51 = vadd.f32 %v2505_v36, %v1656_v47  ;;  %3083 = vmatprep.subr.bf16.mxu0 %v3082_v14 }
0x1149   :  { %2859 = vmatprep.mubr.msk.f32.mxu1 %vm118_vm0, %v3946_v51 }
0x114a   :  { %2860 = vmatmul.mubr.msk.f32.gmra.mrb[22].mxu1 %vm118_vm0, %v3944_v50  ;;  %3085 = vmatpush3.bf16.msra.mxu0 %v3082_v14 }
0x114b   :  { %3087 = vmatprep.subr.bf16.mxu0 %v3086_v3 }
0x114e   :  { %3089 = vmatpush3.bf16.msra.mxu0 %v3086_v3 }
0x1218   :  { %v2858_v5 = vpop.f32.mrb[20].mxu1 }
0x1219   :  { %v1765_v6 = vadd.f32 %v2858_v5, %v2511_v4  ;;  %v1759_v9 = vpop.f32.mrb[21].mxu1 }
0x121a   :  { %v1760_v12 = vadd.f32 %v2511_v4, %v1759_v9 }
0x121b   :  { %v1779_v13 = vmul.f32 %v1765_v6, %v1765_v6 }
0x121c   :  { %v1778_v7 = vmul.f32 %v1760_v12, %v1760_v12 }
0x121d   :  { %v1783_v16 = vmul.f32 %v1779_v13, %v1765_v6  ;;  %v2861_v44 = vpop.f32.mrb[22].mxu1 }
0x121e   :  { %v1782_v42 = vmul.f32 %v1778_v7, %v1760_v12  ;;  %v1775_v17 = vadd.f32 %v2861_v44, %v2511_v4  ;;  %v1769_v18 = vpop.f32.mrb[23].mxu1 }
0x121f   :  { %v1787_v19 = vmul.f32 0.044715, %v1783_v16  ;;  %v1770_v20 = vadd.f32 %v2511_v4, %v1769_v18 }
0x1220   :  { %v1786_v21 = vmul.f32 0.044715, %v1782_v42  ;;  %v1781_v23 = vmul.f32 %v1775_v17, %v1775_v17 }
0x1221   :  { %v1791_v24 = vadd.f32 %v1787_v19, %v1765_v6  ;;  %v1780_v26 = vmul.f32 %v1770_v20, %v1770_v20 }
0x1222   :  { %v1790_v27 = vadd.f32 %v1786_v21, %v1760_v12  ;;  %v1785_v28 = vmul.f32 %v1781_v23, %v1775_v17 }
0x1223   :  { %v1795_v49 = vmul.f32 0.7978846, %v1791_v24  ;;  %v1784_v29 = vmul.f32 %v1780_v26, %v1770_v20 }
0x1224   :  { %v1794_v48 = vmul.f32 0.7978846, %v1790_v27  ;;  %v1789_v31 = vmul.f32 0.044715, %v1785_v28  ;;  %v3388_v27 = vmov 0.0|0.0   ;;  %v3390_v28 = vmov 0.0  }
0x1225   :  { %3236 = vtanh.f32 %v1795_v49  ;;  %v1788_v32 = vmul.f32 0.044715, %v1784_v29  ;;  %3090 = vmatprep.subr.bf16.mxu1 %v3388_v27  ;;  %2908 = vmatprep.mubr.msk.f32.mxu1 %vm3389_vm2, %v3390_v28 }
0x1226   :  { %v1793_v33 = vadd.f32 %v1789_v31, %v1775_v17  ;;  %3238 = vtanh.f32 %v1794_v48 }
0x1227   :  { %v1792_v35 = vadd.f32 %v1788_v32, %v1770_v20 }
0x1228   :  { %v1797_v36 = vmul.f32 0.7978846, %v1793_v33 }
0x1229   :  { %v1796_v37 = vmul.f32 0.7978846, %v1792_v35 }
0x122a   :  { %3240 = vtanh.f32 %v1797_v36 }
0x122b   :  { %3242 = vtanh.f32 %v1796_v37 }
0x122f   :  { %v3237_v38 = vpop.eup %3236 }
0x1230   :  { %v3239_v39 = vpop.eup %3238  ;;  %v1803_v40 = vadd.f32 1.0, %v3237_v38 }
0x1231   :  { %v1802_v43 = vadd.f32 1.0, %v3239_v39 }
0x1232   :  { %v1807_v45 = vmul.f32 0.5, %v1803_v40 }
0x1233   :  { %v1806_v46 = vmul.f32 0.5, %v1802_v43 }
0x1234   :  { %v3241_v47 = vpop.eup %3240  ;;  %v1811_v54 = vmul.f32 %v1807_v45, %v1765_v6  ;;  %v2536_v45 = vld [vmem:[%s4114_s15 + $0x1] ss:$0 sm:$0xff] }
0x1235   :  { %v3243_v22 = vpop.eup %3242  ;;  %v1810_v25 = vmul.f32 %v1806_v46, %v1760_v12  ;;  %v1805_v60 = vadd.f32 1.0, %v3241_v47 }
0x1236   :  { %v1804_v52 = vadd.f32 1.0, %v3243_v22 }
0x1237   :  { %2894 = vmatprep.mubr.f32.mxu0 %v1810_v25  ;;  %v1809_v53 = vmul.f32 0.5, %v1805_v60  ;;  %v2537_v25 = vld [vmem:[%s4115_s16 + $0x1] ss:$0 sm:$0xff] }
0x1238   :  { %2895 = vmatmul.mubr.f32.vlgmr.msra.gmra.mrb[20].mxu0 %v1811_v54  ;;  %v1808_v55 = vmul.f32 0.5, %v1804_v52 }
0x1239   :  { %v1813_v8 = vmul.f32 %v1809_v53, %v1775_v17 }
0x123a   :  { %v1812_v10 = vmul.f32 %v1808_v55, %v1770_v20 }
0x123c   :  { %2897 = vmatprep.mubr.f32.mxu0 %v1812_v10 }
0x123d   :  { %2898 = vmatmul.mubr.f32.gmra.mrb[22].mxu0 %v1813_v8 }
0x130b   :  { %v2896_v57 = vpop.f32.mrb[20].mxu0 }
0x130c   :  { %v1911_v58 = vadd.f32 %v2896_v57, %v2533_v56  ;;  %v1905_v30 = vpop.f32.mrb[21].mxu0 }
0x130d   :  { %v1906_v59 = vadd.f32 %v2533_v56, %v1905_v30 }
0x130e   :  { %v1925_v34 = vadd.f32 %v1911_v58, %v3938_v15 }
0x130f   :  { %v1924_v61 = vadd.f32 %v1906_v59, %v3936_v41 }
0x1310   :  { %v2899_v63 = vpop.f32.mrb[22].mxu0  ;;  %v1935_v1 = vsel %vm118_vm0, %v1925_v34, 0.0 }
0x1311   :  { %v1921_v0 = vadd.f32 %v2899_v63, %v2533_v56  ;;  %v1915_v11 = vpop.f32.mrb[23].mxu0  ;;  %1936 = vadd.xlane.f32.xlu1 %v1935_v1  ;;  %v1932_v14 = vsel %vm118_vm0, %v1924_v61, 0.0  ;;  %v2004_v63 = vld [vmem:[%s4157_s7] sm:$0xf] }
0x1312   :  { %v1916_v62 = vadd.f32 %v2533_v56, %v1915_v11  ;;  %1933 = vadd.xlane.f32.xlu0 %v1932_v14 }
0x1313   :  { %v1927_v2 = vadd.f32 %v1921_v0, %v3944_v50 }
0x1314   :  { %v1926_v3 = vadd.f32 %v1916_v62, %v3946_v51 }
0x1315   :  { %v1941_v4 = vsel %vm118_vm0, %v1927_v2, 0.0 }
0x1316   :  { %1942 = vadd.xlane.f32.xlu1 %v1941_v4  ;;  %v1938_v15 = vsel %vm118_vm0, %v1926_v3, 0.0 }
0x1317   :  { %1939 = vadd.xlane.f32.xlu0 %v1938_v15  ;;  %v2108_v15 = vld [vmem:[#allocation3] sm:$0xff] }
0x139e   :  { %v1937_v41 = vpop.xlane.xlu1 %1936 }
0x139f   :  { %v1945_v5 = vmul.f32 0.03125, %v1937_v41  ;;  %v1934_v6 = vpop.xlane.xlu0 %1933  ;;  %v2109_v41 = vld [vmem:[#allocation3 + $0x8] sm:$0xff] }
0x13a0   :  { %v1944_v9 = vmul.f32 0.03125, %v1934_v6  ;;  %v2110_v6 = vld [vmem:[#allocation3 + $0x10] sm:$0xff] }
0x13a1   :  { %v1949_v12 = vsub.f32 %v1925_v34, %v1945_v5  ;;  %v3097_v5 = vpack.c.bf16 %v2109_v41, %v2108_v15 }
0x13a2   :  { %v1948_v13 = vsub.f32 %v1924_v61, %v1944_v9  ;;  %v2111_v9 = vld [vmem:[#allocation3 + $0x18] sm:$0xff] }
0x13a3   :  { %v1943_v7 = vpop.xlane.xlu1 %1942  ;;  %v1953_v16 = vmul.f32 %v1949_v12, %v1949_v12 }
0x13a4   :  { %v1947_v44 = vmul.f32 0.03125, %v1943_v7  ;;  %v1940_v42 = vpop.xlane.xlu0 %1939  ;;  %v1952_v17 = vmul.f32 %v1948_v13, %v1948_v13 }
0x13a5   :  { %v1946_v50 = vmul.f32 0.03125, %v1940_v42  ;;  %v1959_v51 = vsel %vm118_vm0, %v1953_v16, 0.0  ;;  %v2539_v42 = vld [vmem:[%s4116_s17] ss:$0 sm:$0xff] }
0x13a6   :  { %v1951_v18 = vsub.f32 %v1927_v2, %v1947_v44  ;;  %1960 = vadd.xlane.f32.xlu1 %v1959_v51  ;;  %v1956_v19 = vsel %vm118_vm0, %v1952_v17, 0.0  ;;  %v2193_v51 = vld [vmem:[#allocation6 + $0x8] sm:$0xff] }
0x13a7   :  { %v1950_v20 = vsub.f32 %v1926_v3, %v1946_v50  ;;  %1957 = vadd.xlane.f32.xlu0 %v1956_v19  ;;  %v2192_v50 = vld [vmem:[#allocation6] sm:$0xff] }
0x13a8   :  { %v1955_v21 = vmul.f32 %v1951_v18, %v1951_v18 }
0x13a9   :  { %v1954_v23 = vmul.f32 %v1950_v20, %v1950_v20 }
0x13aa   :  { %v1965_v24 = vsel %vm118_vm0, %v1955_v21, 0.0 }
0x13ab   :  { %1966 = vadd.xlane.f32.xlu1 %v1965_v24  ;;  %v1962_v26 = vsel %vm118_vm0, %v1954_v23, 0.0  ;;  %v2194_v23 = vld [vmem:[#allocation6 + $0x10] sm:$0xff]  ;;  %v2195_v24 = vld [vmem:[#allocation6 + $0x18] sm:$0xff] }
0x13ac   :  { %1963 = vadd.xlane.f32.xlu0 %v1962_v26  ;;  %v3106_v26 = vpack.c.bf16 %v2195_v24, %v2194_v23 }
0x1433   :  { %v1961_v49 = vpop.xlane.xlu1 %1960 }
0x1434   :  { %v1969_v29 = vmul.f32 0.03125, %v1961_v49  ;;  %v1958_v48 = vpop.xlane.xlu0 %1957 }
0x1435   :  { %v1968_v31 = vmul.f32 0.03125, %v1958_v48 }
0x1436   :  { %v1973_v32 = vadd.f32 1e-12, %v1969_v29  ;;  %v2541_v29 = vld [vmem:[%s4119_s20] ss:$0 sm:$0xff] }
0x1437   :  { %v1972_v33 = vadd.f32 1e-12, %v1968_v31 }
0x1438   :  { %3244 = vrsqrt.f32 %v1973_v32  ;;  %v1967_v35 = vpop.xlane.xlu1 %1966 }
0x1439   :  { %3246 = vrsqrt.f32 %v1972_v33  ;;  %v1971_v36 = vmul.f32 0.03125, %v1967_v35  ;;  %v1964_v37 = vpop.xlane.xlu0 %1963  ;;  %v2543_v35 = vld [vmem:[%s4121_s22] ss:$0 sm:$0xff]  ;;  %s3391_s22 = smov [#allocation9]  }
0x143a   :  { %v1970_v38 = vmul.f32 0.03125, %v1964_v37  ;;  %s2409_s8 = sshll.u32 %s3391_s22, 4  ;;  %s2410_s8 = int_to_ptr.vmem [resolvable:$true] %s2409_s8 }
0x143b   :  { %v1975_v39 = vadd.f32 1e-12, %v1971_v36  ;;  %s3308_s28 = scalar_lea.vmem %s2410_s8, 32  ;;  %p3313_p3 = scmp.lt.s32.totalorder %s2410_s8, %s2410_s8 }
0x143c   :  { %v1974_v40 = vadd.f32 1e-12, %v1970_v38  ;;  %p3309_p2 = scmp.ne.s32.totalorder %s2410_s8, %s3308_s28  ;;  %p3314_p4 = scmp.lt.s32.totalorder %s3308_s28, %s3308_s28 }
0x143d   :  { %3248 = vrsqrt.f32 %v1975_v39 }
0x143e   :  { %3250 = vrsqrt.f32 %v1974_v40  ;;  %v2305_v40 = vld [vmem:[#allocation2] sm:$0x1]  ;;  %p3315_p5 = por %p3314_p4, %p3313_p3 }
0x143f   :  { %3108 = vpush %v2305_v40 }
0x1440   :  { %p3316_p6 = pnand %p3315_p5, %p3309_p2 }
0x1442   :  { %v3245_v43 = vpop.eup %3244 }
0x1443   :  { %v3247_v46 = vpop.eup %3246  ;;  %v1981_v47 = vmul.f32 %v3245_v43, %v1949_v12  ;;  %v3100_v12 = vpack.c.bf16 %v2111_v9, %v2110_v6 }
0x1444   :  { %v1980_v22 = vmul.f32 %v3247_v46, %v1948_v13 }
0x1445   :  { %v1991_v60 = vmul.f32 %v2536_v45, %v1981_v47 }
0x1446   :  { %v1990_v54 = vmul.f32 %v2536_v45, %v1980_v22 }
0x1447   :  { %v3249_v52 = vpop.eup %3248  ;;  %v2001_v53 = vadd.f32 %v2537_v25, %v1991_v60 }
0x1448   :  { %v3251_v55 = vpop.eup %3250  ;;  %v1983_v10 = vmul.f32 %v3249_v52, %v1951_v18  ;;  %v2000_v8 = vadd.f32 %v2537_v25, %v1990_v54  ;;  %v2540_v18 = vld [vmem:[%s4117_s18] ss:$0 sm:$0xff] }
0x1449   :  { %v1982_v56 = vmul.f32 %v3251_v55, %v1950_v20  ;;  %v3103_v20 = vpack.c.bf16 %v2193_v51, %v2192_v50 }
0x144a   :  { %v3091_v57 = vpack.c.bf16 %v2001_v53, %v2000_v8  ;;  %v1993_v58 = vmul.f32 %v2536_v45, %v1983_v10 }
0x144b   :  { %v1992_v30 = vmul.f32 %v2536_v45, %v1982_v56 }
0x144c   :  { %3092 = vmatpush3.bf16.msra.mxu1 %v3091_v57  ;;  %v2003_v59 = vadd.f32 %v2537_v25, %v1993_v58 }
0x144d   :  { %3093 = vmatprep.subr.bf16.mxu1 %v3388_v27  ;;  %v2002_v34 = vadd.f32 %v2537_v25, %v1992_v30 }
0x144f   :  { %v3094_v61 = vpack.c.bf16 %v2003_v59, %v2002_v34 }
0x1451   :  { %3095 = vmatpush3.bf16.msra.mxu1 %v3094_v61 }
0x1452   :  { %3096 = vmatprep.subr.bf16.mxu1 %v3388_v27 }
0x1454   :  { %2909 = vmatmul.mubr.msk.f32.vlgmr.msra.gmra.mrb[24].mxu1 %vm118_vm0, %v2004_v63 }
0x1455   :  { %2919 = vmatprep.mubr.msk.f32.mxu1 %vm3389_vm2, %v3390_v28  ;;  %3098 = vmatpush3.bf16.msra.mxu1 %v3097_v5 }
0x1456   :  { %3099 = vmatprep.subr.bf16.mxu1 %v3388_v27 }
0x1459   :  { %3101 = vmatpush3.bf16.msra.mxu1 %v3100_v12 }
0x145a   :  { %3102 = vmatprep.subr.bf16.mxu1 %v3388_v27 }
0x1470   :  { %s3109_s20 = spop %3108 }
0x1471   :  { %v2307_v43 = vstv %s3109_s20 }
0x1472   :  { %v2308_v45 = vmul.f32 1.442695, %v2307_v43 }
0x1527   :  { %v2074_v1 = vpop.f32.mrb[24].mxu1 }
0x1528   :  { %v2910_v0 = vpop.f32.mrb[25].mxu1  ;;  %v2081_v11 = vsel %vm2080_vm3, %v2074_v1, 0.0 }
0x1529   :  { %2082 = vadd.xlane.f32.xlu0 %v2081_v11 }
0x15b6   :  { %v2083_v14 = vpop.xlane.xlu0 %2082 }
0x15b7   :  { %v2084_v62 = vmul.f32 0.03125, %v2083_v14 }
0x15b9   :  { %v2085_v2 = vsub.f32 %v2074_v1, %v2084_v62 }
0x15bb   :  { %v2086_v3 = vmul.f32 %v2085_v2, %v2085_v2 }
0x15bd   :  { %v2087_v4 = vsel %vm2080_vm3, %v2086_v3, 0.0 }
0x15be   :  { %2088 = vadd.xlane.f32.xlu1 %v2087_v4 }
0x164b   :  { %v2089_v13 = vpop.xlane.xlu1 %2088 }
0x164c   :  { %v2090_v7 = vmul.f32 0.03125, %v2089_v13 }
0x164e   :  { %v2091_v16 = vadd.f32 1e-12, %v2090_v7 }
0x1650   :  { %3252 = vrsqrt.f32 %v2091_v16 }
0x1651   :  { %3254 = vpow2.f32 %v2308_v45 }
0x165a   :  { %v3253_v44 = vpop.eup %3252 }
0x165b   :  { %v2093_v17 = vmul.f32 %v3253_v44, %v2085_v2  ;;  %v3255_v46 = vpop.eup %3254 }
0x165c   :  { %3110 = vpush %v3255_v46 }
0x165d   :  { %v2100_v19 = vmul.f32 %v2539_v42, %v2093_v17 }
0x165f   :  { %v2107_v21 = vadd.f32 %v2540_v18, %v2100_v19 }
0x1661   :  { %2920 = vmatmul.mubr.msk.f32.vlgmr.msra.gmra.mrb[26].mxu1 %vm118_vm0, %v2107_v21  ;;  %v2203_v49 = vrot.slane %v2107_v21, 2 }
0x1662   :  { %3104 = vmatpush3.bf16.msra.mxu1 %v3103_v20  ;;  %2930 = vmatprep.mubr.msk.f32.mxu1 %vm3389_vm2, %v3390_v28 }
0x1663   :  { %3105 = vmatprep.subr.bf16.mxu1 %v3388_v27 }
0x1666   :  { %3107 = vmatpush3.bf16.msra.mxu1 %v3106_v26 }
0x1667   :  { %2933 = vmatprep.subr.mxu1 %v3390_v28 }
0x1669   :  { %2931 = vmatmul.mubr.msk.f32.vlgmr.msra.gmra.mrb[28].mxu1 %vm118_vm0, %v2203_v49 }
0x166a   :  { %2935 = vmatprep.mubr.msk.f32.mxu1 %vm3389_vm2, %v3390_v28 }
0x1734   :  { %v2188_v48 = vpop.f32.mrb[26].mxu1 }
0x1735   :  { %v2189_v31 = vadd.f32 %v2541_v29, %v2188_v48  ;;  %v2921_v32 = vpop.f32.mrb[27].mxu1 }
0x1737   :  { %v2276_v33 = vmul.f32 %v2189_v31, %v2189_v31 }
0x1739   :  { %v2278_v27 = vsel %vm2277_vm4, %v2276_v33, 0.0 }
0x173a   :  { %2279 = vadd.xlane.f32.xlu1 %v2278_v27 }
0x173c   :  { %v2272_v36 = vpop.f32.mrb[28].mxu1 }
0x173d   :  { %v2273_v37 = vadd.f32 %v2543_v35, %v2272_v36  ;;  %v2932_v38 = vpop.f32.mrb[29].mxu1 }
0x173f   :  { %v2291_v28 = vmul.f32 %v2273_v37, %v2273_v37 }
0x1741   :  { %v2292_v39 = vsel %vm2277_vm4, %v2291_v28, 0.0 }
0x1742   :  { %2293 = vadd.xlane.f32.xlu0 %v2292_v39 }
0x17c7   :  { %v2280_v47 = vpop.xlane.xlu1 %2279 }
0x17c8   :  { %3256 = vrsqrt.f32 %v2280_v47  ;;  %vm2283_vm5 = vcmp.eq.f32.partialorder %v2280_v47, inf  ;;  %v2286_v54 = vand.u32 2147483648, %v2280_v47  ;;  %vm2285_vm6 = vcmp.eq.f32.partialorder %v2280_v47, 0.0 }
0x17cf   :  { %v2294_v22 = vpop.xlane.xlu0 %2293 }
0x17d0   :  { %3258 = vrsqrt.f32 %v2294_v22  ;;  %vm2297_vm7 = vcmp.eq.f32.partialorder %v2294_v22, inf  ;;  %v2300_v56 = vand.u32 2147483648, %v2294_v22  ;;  %vm2299_vm8 = vcmp.eq.f32.partialorder %v2294_v22, 0.0 }
0x17d2   :  { %v3257_v25 = vpop.eup %3256 }
0x17d3   :  { %v2282_v60 = vmul.f32 %v3257_v25, %v2280_v47 }
0x17d5   :  { %v2284_v52 = vsel %vm2283_vm5, %v2280_v47, %v2282_v60 }
0x17d6   :  { %v2287_v53 = vsel %vm2285_vm6, %v2286_v54, %v2284_v52 }
0x17d7   :  { %v2288_v55 = vmax.f32 %v2287_v53, 1e-12 }
0x17d9   :  { %3260 = vrcp.f32 %v2288_v55 }
0x17da   :  { %v3259_v10 = vpop.eup %3258 }
0x17db   :  { %v2296_v8 = vmul.f32 %v3259_v10, %v2294_v22 }
0x17dd   :  { %v2298_v57 = vsel %vm2297_vm7, %v2294_v22, %v2296_v8 }
0x17de   :  { %v2301_v58 = vsel %vm2299_vm8, %v2300_v56, %v2298_v57 }
0x17df   :  { %v2302_v30 = vmax.f32 %v2301_v58, 1e-12 }
0x17e1   :  { %3262 = vrcp.f32 %v2302_v30 }
0x17e3   :  { %v3261_v59 = vpop.eup %3260 }
0x17e4   :  { %v2290_v34 = vmul.f32 %v3261_v59, %v2189_v31 }
0x17e6   :  { %2391 = vst.msk [vmem:[#allocation9] sm:$0x3] %vm2277_vm4, %v2290_v34 }
0x17eb   :  { %v3263_v61 = vpop.eup %3262 }
0x17ec   :  { %v2304_v63 = vmul.f32 %v3263_v61, %v2273_v37 }
0x17ee   :  { %2934 = vmatpush3.xpose.msk.msra.mxu1 %vm118_vm0, %v2304_v63  ;;  %2392 = vst.msk [vmem:[#allocation11] sm:$0x3] %vm2277_vm4, %v2304_v63 }
0x17f1   :  { %2936 = vmatmul.mubr.msk.f32.vlgmr.msra.gmra.mrb[30].mxu1 %vm118_vm0, %v2290_v34 }
0x17f2   :  { %3319 = shalt.err (!%p3316_p6)
}
0x17f3   :  { %s3320_s9 = scalar_lea.hbm %s4124_s25, 32 }
0x17f4   :  { %p3321_p7 = scmp.ne.s32.totalorder %s4124_s25, %s3320_s9  ;;  %p3324_p8 = scmp.lt.u32.totalorder %s3320_s9, %s4124_s25 }
0x17f6   :  { %p3326_p9 = pnand %p3324_p8, %p3321_p7 }
0x17f8   :  { %3329 = shalt.err (!%p3326_p9)
}
0x17f9   :  { %2412 = dma.vmem_to_hbm [thread:$0]  %s2410_s8, 32, %s4124_s25, [#allocation10]  }
0x17fa   :  { %s3392_s14 = smov [#allocation11]  }
0x17fb   :  { %s2419_s11 = sshll.u32 %s3392_s14, 4  ;;  %s2420_s11 = int_to_ptr.vmem [resolvable:$true] %s2419_s11 }
0x17fc   :  { %s3330_s23 = scalar_lea.vmem %s2420_s11, 32  ;;  %p3335_p11 = scmp.lt.s32.totalorder %s2420_s11, %s2420_s11 }
0x17fd   :  { %p3331_p10 = scmp.ne.s32.totalorder %s2420_s11, %s3330_s23  ;;  %p3336_p12 = scmp.lt.s32.totalorder %s3330_s23, %s3330_s23 }
0x17ff   :  { %p3337_p13 = por %p3336_p12, %p3335_p11 }
0x1801   :  { %p3338_p0 = pnand %p3337_p13, %p3331_p10 }
0x1803   :  { %3341 = shalt.err (!%p3338_p0)
}
0x1804   :  { %s3342_s16 = scalar_lea.hbm %s4125_s26, 32 }
0x1805   :  { %p3343_p1 = scmp.ne.s32.totalorder %s4125_s26, %s3342_s16  ;;  %p3346_p2 = scmp.lt.u32.totalorder %s3342_s16, %s4125_s26 }
0x1807   :  { %p3348_p3 = pnand %p3346_p2, %p3343_p1 }
0x1809   :  { %3351 = shalt.err (!%p3348_p3)
}
0x180a   :  { %2422 = dma.vmem_to_hbm [thread:$0]  %s2420_s11, 32, %s4125_s26, [#allocation10]   ;;  %vm2389_vm9 = vcmask 9216  }
0x180b   :  { %s3111_s17 = spop %3110  ;;  %s3393_s18 = smov [#allocation8]  }
0x180c   :  { %v2387_v1 = vstv %s3111_s17  ;;  %s2399_s29 = sshll.u32 %s3393_s18, 4  ;;  %s2400_s29 = int_to_ptr.vmem [resolvable:$true] %s2399_s29 }
0x180d   :  { %s3352_s1 = scalar_lea.vmem %s2400_s29, 32  ;;  %p3357_p5 = scmp.lt.s32.totalorder %s2400_s29, %s2400_s29 }
0x180e   :  { %p3353_p4 = scmp.ne.s32.totalorder %s2400_s29, %s3352_s1  ;;  %p3358_p6 = scmp.lt.s32.totalorder %s3352_s1, %s3352_s1 }
0x1810   :  { %p3359_p7 = por %p3358_p6, %p3357_p5 }
0x1812   :  { %p3360_p8 = pnand %p3359_p7, %p3353_p4 }
0x18c4   :  { %v2383_v0 = vpop.f32.mrb[30].mxu1 }
0x18c5   :  { %v2388_v11 = vmul.f32 %v2387_v1, %v2383_v0  ;;  %v2937_v14 = vpop.f32.mrb[31].mxu1 }
0x18c7   :  { %2390 = vst.msk [vmem:[#allocation8] sm:$0x3] %vm2389_vm9, %v2388_v11 }
0x18c8   :  { %3363 = shalt.err (!%p3360_p8)
}
0x18c9   :  { %s3364_s26 = scalar_lea.hbm %s4123_s24, 32 }
0x18ca   :  { %p3365_p9 = scmp.ne.s32.totalorder %s4123_s24, %s3364_s26  ;;  %p3368_p10 = scmp.lt.u32.totalorder %s3364_s26, %s4123_s24 }
0x18cc   :  { %p3370_p11 = pnand %p3368_p10, %p3365_p9 }
0x18ce   :  { %3373 = shalt.err (!%p3370_p11)
}
0x18cf   :  { %2402 = dma.vmem_to_hbm [thread:$0]  %s2400_s29, 32, %s4123_s24, [#allocation5]  }
0x18d0   :  { %3378 = dma.done.wait [#allocation5], 32  }
0x18d1   :  { %3379 = vsyncadd [#allocation5], 4294967264 }
0x18d2   :  { %3380 = dma.done.wait [#allocation10], 64  }
0x18d3   :  { %3381 = vsyncadd [#allocation10], 4294967232 }
0x18d4   :  { %2432 = vsyncpa [#allocation4], 1 }
0x18d5   :  { %2433 = vsyncpa [#allocation7], 1 }
0x18d6   :  { %2434 = vsyncpa [#allocation5], 1 }
0x18d7   :  { %2435 = vsyncpa [#allocation10], 1 }

</bundles_post_ra>
